<compile_context>
chip_gen: v7x
topology: tpu7x:2x2x1
jax: 0.10.0
libtpu: 0.0.40
codegen_flags: <defaults>
</compile_context>

<pallas_src>
import jax
import jax.numpy as jnp
from jax.experimental import pallas as pl
from jax.experimental.pallas import tpu as pltpu

D    = 63    # RNN input_size == hidden_size (logical)
H1   = 16    # dense1 hidden (logical)
OUT  = 3     # out_features (logical)

DP   = 128   # padded feature dim (lane-dense)
H1P  = 128   # padded dense1 dim
OUTP = 128   # padded output dim


def _make_kernel(T, Tc, n_chunks):
    """Kernel factory: T / Tc / n_chunks are static Python ints (closed over)."""

    def kernel(x_ref,                         # (Tc, Bp, DP) time-chunk
               wih0_ref, whh0_ref, b0_ref,    # (DP,DP),(DP,DP),(1,DP)
               wih1_ref, whh1_ref, b1_ref,    # (DP,DP),(DP,DP),(1,DP)
               wd1_ref, bd1_ref,              # dense1 (DP,H1P),(1,H1P)
               wd2_ref, bd2_ref,              # dense2 (H1P,OUTP),(1,OUTP)
               out_ref,                       # (Bp, OUTP)
               h0_ref, h1_ref,                # persistent VMEM hidden state (Bp, DP)
               xw_ref):                       # VMEM scratch for hoisted input proj (Tc,Bp,DP)
        c = pl.program_id(0)
        _, Bp, Dp = x_ref.shape

        # PyTorch default h_0 = 0: zero hidden state on the first chunk only.
        @pl.when(c == 0)
        def _():
            h0_ref[...] = jnp.zeros_like(h0_ref)
            h1_ref[...] = jnp.zeros_like(h1_ref)

        # ---- hoisted layer-0 input projection: ONE (Tc*Bp,128)x(128,128) matmul ----
        # Result goes to VMEM scratch (not vregs) to keep register pressure off the
        # serial recurrence; per-step slices hide under MXU latency.
        x_flat = x_ref[...].reshape(Tc * Bp, Dp)
        xw = jnp.dot(x_flat, wih0_ref[...], preferred_element_type=jnp.float32)
        xw_ref[...] = (xw + b0_ref[...]).reshape(Tc, Bp, Dp)

        # bias broadcast hoisted once (1 vreg at these sizes; avoids per-iter broadcast)
        b1b = jnp.broadcast_to(b1_ref[...], (Bp, Dp))

        h0 = h0_ref[...]
        h1 = h1_ref[...]

        # ---- serial recurrence: fully unrolled (Tc static), 2 matmuls on the
        #      critical path per step; the W_hh1 dot is independent of h0_new so the
        #      scheduler can overlap it with the layer-0 matmul+tanh. ----
        for t in range(Tc):
            h1_hh = jnp.dot(h1, whh1_ref[...],
                            preferred_element_type=jnp.float32)          # off crit-path
            h0_new = jnp.tanh(
                jnp.dot(h0, whh0_ref[...], preferred_element_type=jnp.float32)
                + xw_ref[t])
            h1_new = jnp.tanh(
                jnp.dot(h0_new, wih1_ref[...], preferred_element_type=jnp.float32)
                + h1_hh + b1b)

            # Only steps that can fall past the true sequence length (padded tail of
            # the last ragged chunk) need masking; everything else is unconditional.
            if (n_chunks - 1) * Tc + t >= T:
                valid = (c * Tc + t) < T
                h0 = jnp.where(valid, h0_new, h0)
                h1 = jnp.where(valid, h1_new, h1)
            else:
                h0, h1 = h0_new, h1_new

        h0_ref[...] = h0
        h1_ref[...] = h1

        # ---- dense head only after the last time-chunk ----
        @pl.when(c == n_chunks - 1)
        def _():
            z = jnp.dot(h1, wd1_ref[...], preferred_element_type=jnp.float32) + bd1_ref[...]
            z = jnp.maximum(z, 0.0)                                      # ReLU
            out_ref[...] = (jnp.dot(z, wd2_ref[...], preferred_element_type=jnp.float32)
                            + bd2_ref[...]).astype(out_ref.dtype)

    return kernel


def init_params(key):
    """Deterministic init mimicking PyTorch defaults (uniform(-1/sqrt(fan), 1/sqrt(fan)))."""
    ks = jax.random.split(key, 12)
    krnn = 1.0 / jnp.sqrt(jnp.float32(D))
    klin1 = 1.0 / jnp.sqrt(jnp.float32(D))
    klin2 = 1.0 / jnp.sqrt(jnp.float32(H1))
    u = lambda k, shape, lim: jax.random.uniform(k, shape, jnp.float32, -lim, lim)

    # PyTorch stores W_ih (H, in), W_hh (H, H) and computes x @ W^T; pre-transpose here.
    w_ih0 = u(ks[0], (D, D), krnn); w_hh0 = u(ks[1], (D, D), krnn)
    b_ih0 = u(ks[2], (D,), krnn);   b_hh0 = u(ks[3], (D,), krnn)
    w_ih1 = u(ks[4], (D, D), krnn); w_hh1 = u(ks[5], (D, D), krnn)
    b_ih1 = u(ks[6], (D,), krnn);   b_hh1 = u(ks[7], (D,), krnn)
    w_d1  = u(ks[8], (H1, D), klin1);  b_d1 = u(ks[9], (H1,), klin1)
    w_d2  = u(ks[10], (OUT, H1), klin2); b_d2 = u(ks[11], (OUT,), klin2)

    return {
        "wih0_t": w_ih0.T, "whh0_t": w_hh0.T, "b0": (b_ih0 + b_hh0).reshape(1, D),
        "wih1_t": w_ih1.T, "whh1_t": w_hh1.T, "b1": (b_ih1 + b_hh1).reshape(1, D),
        "wd1_t": w_d1.T, "bd1": b_d1.reshape(1, H1),
        "wd2_t": w_d2.T, "bd2": b_d2.reshape(1, OUT),
    }


def pad_params(p):
    """Zero-pad logical weights to lane-dense padded shapes."""
    def pad2(w, r, c):
        return jnp.zeros((r, c), jnp.float32).at[:w.shape[0], :w.shape[1]].set(w)

    return {
        "wih0": pad2(p["wih0_t"], DP, DP),
        "whh0": pad2(p["whh0_t"], DP, DP),
        "b0":   pad2(p["b0"], 1, DP),
        "wih1": pad2(p["wih1_t"], DP, DP),
        "whh1": pad2(p["whh1_t"], DP, DP),
        "b1":   pad2(p["b1"], 1, DP),
        "wd1":  pad2(p["wd1_t"], DP, H1P),
        "bd1":  pad2(p["bd1"], 1, H1P),
        "wd2":  pad2(p["wd2_t"], H1P, OUTP),
        "bd2":  pad2(p["bd2"], 1, OUTP),
    }


def _pick_time_chunk(T, Bp, max_chunk=128, vmem_cap_bytes=8 << 20):
    """Largest time chunk (<= max_chunk) whose double-buffered x block stays well under
    the scoped-VMEM default on every generation (v5e's 16 MiB is the binding one)."""
    tc_vmem = max(1, vmem_cap_bytes // (2 * Bp * DP * 4))
    return max(1, min(T, max_chunk, tc_vmem))


def rnn_forward(x, p, *, max_chunk=128):
    """x: (B, 1, T, 63) float32 -> (B, 3) float32."""
    xb = jnp.squeeze(x, axis=1)          # (B, T, D)  -- torch.squeeze(x, 1)
    B, T, _ = xb.shape
    xt = jnp.transpose(xb, (1, 0, 2))    # (T, B, D)  time-major for the kernel

    Bp = max(8, ((B + 7) // 8) * 8)
    Tc = _pick_time_chunk(T, Bp, max_chunk=max_chunk)
    n_chunks = -(-T // Tc)               # ceil-div; ragged last chunk masked in-kernel
    T_pad = n_chunks * Tc

    xp = jnp.pad(xt, ((0, T_pad - T), (0, Bp - B), (0, DP - D)))   # zero-padded
    pp = pad_params(p)

    grid_spec = pltpu.PrefetchScalarGridSpec(
        num_scalar_prefetch=0,
        grid=(n_chunks,),
        in_specs=[
            pl.BlockSpec((Tc, Bp, DP), lambda c: (c, 0, 0)),    # x: stream time chunks
            pl.BlockSpec((DP, DP),      lambda c: (0, 0)),      # W_ih0
            pl.BlockSpec((DP, DP),      lambda c: (0, 0)),      # W_hh0
            pl.BlockSpec((1, DP),       lambda c: (0, 0)),      # b0
            pl.BlockSpec((DP, DP),      lambda c: (0, 0)),      # W_ih1
            pl.BlockSpec((DP, DP),      lambda c: (0, 0)),      # W_hh1
            pl.BlockSpec((1, DP),       lambda c: (0, 0)),      # b1
            pl.BlockSpec((DP, H1P),     lambda c: (0, 0)),      # dense1 W
            pl.BlockSpec((1, H1P),      lambda c: (0, 0)),      # dense1 b
            pl.BlockSpec((H1P, OUTP),   lambda c: (0, 0)),      # dense2 W
            pl.BlockSpec((1, OUTP),     lambda c: (0, 0)),      # dense2 b
        ],
        out_specs=pl.BlockSpec((Bp, OUTP), lambda c: (0, 0)),   # resident across chunks
        scratch_shapes=[pltpu.VMEM((Bp, DP), jnp.float32),      # h layer 0 (persistent)
                        pltpu.VMEM((Bp, DP), jnp.float32),      # h layer 1 (persistent)
                        pltpu.VMEM((Tc, Bp, DP), jnp.float32)], # hoisted input projection
    )

    flops = int(
        2 * T_pad * Bp * DP * DP            # hoisted input projection
        + 3 * 2 * T_pad * Bp * DP * DP      # 3 recurrent matmuls / step
        + 2 * Bp * (DP * H1P + H1P * OUTP)  # dense head
    )
    bytes_accessed = int((xp.size + sum(int(v.size) for v in pp.values()) + Bp * OUTP) * 4)
    cost = pl.CostEstimate(flops=flops,
                           transcendentals=int(2 * T_pad * Bp * DP),
                           bytes_accessed=bytes_accessed)

    out = pl.pallas_call(
        _make_kernel(T, Tc, n_chunks),
        out_shape=jax.ShapeDtypeStruct((Bp, OUTP), jnp.float32),
        grid_spec=grid_spec,
        compiler_params=pltpu.CompilerParams(dimension_semantics=("arbitrary",)),
        cost_estimate=cost,
    )(xp,
      pp["wih0"], pp["whh0"], pp["b0"],
      pp["wih1"], pp["whh1"], pp["b1"],
      pp["wd1"], pp["bd1"], pp["wd2"], pp["bd2"])

    return out[:B, :OUT]


def ref_forward(x, p):
    """Pure-JAX reference for correctness check (logical, unpadded math)."""
    xb = jnp.squeeze(x, axis=1)
    B, T, _ = xb.shape
    h0 = jnp.zeros((B, D), jnp.float32)
    h1 = jnp.zeros((B, D), jnp.float32)
    for t in range(T):
        h0 = jnp.tanh(xb[:, t, :] @ p["wih0_t"] + h0 @ p["whh0_t"] + p["b0"])
        h1 = jnp.tanh(h0 @ p["wih1_t"] + h1 @ p["whh1_t"] + p["b1"])
    z = jnp.maximum(h1 @ p["wd1_t"] + p["bd1"], 0.0)
    return z @ p["wd2_t"] + p["bd2"]


if __name__ == "__main__":
    key = jax.random.PRNGKey(0)
    kx, kp = jax.random.split(key)

    B, T = 2, 8
    x = jax.random.normal(kx, (B, 1, T, D), jnp.float32)   # (B, C=1, T, 63)
    params = init_params(kp)

    ref = jax.block_until_ready(ref_forward(x, params))

    # Default chunking (single chunk here).
    out = jax.block_until_ready(rnn_forward(x, params))
    assert out.shape == (B, OUT), out.shape
    assert jnp.allclose(out, ref, atol=1e-4, rtol=1e-4), (out, ref)

    # Force multi-chunk + ragged last chunk (Tc=3 -> chunks of 3,3,2) to exercise the
    # persistent-hidden-state carry and the in-kernel tail mask.
    out_ragged = jax.block_until_ready(rnn_forward(x, params, max_chunk=3))
    assert jnp.allclose(out_ragged, ref, atol=1e-4, rtol=1e-4), (out_ragged, ref)

    print("KERNEL_OK")
</pallas_src>

<mosaic_0001>
module attributes {stable_mosaic.version = 11 : i64} {
  func.func @kernel(%arg0: i32, %arg1: memref<8x8x128xf32, #tpu.memory_space<vmem>>, %arg2: memref<128x128xf32, #tpu.memory_space<vmem>>, %arg3: memref<128x128xf32, #tpu.memory_space<vmem>>, %arg4: memref<1x128xf32, #tpu.memory_space<vmem>>, %arg5: memref<128x128xf32, #tpu.memory_space<vmem>>, %arg6: memref<128x128xf32, #tpu.memory_space<vmem>>, %arg7: memref<1x128xf32, #tpu.memory_space<vmem>>, %arg8: memref<128x128xf32, #tpu.memory_space<vmem>>, %arg9: memref<1x128xf32, #tpu.memory_space<vmem>>, %arg10: memref<128x128xf32, #tpu.memory_space<vmem>>, %arg11: memref<1x128xf32, #tpu.memory_space<vmem>>, %arg12: memref<8x128xf32, #tpu.memory_space<vmem>>, %arg13: memref<8x128xf32, #tpu.memory_space<vmem>>, %arg14: memref<8x128xf32, #tpu.memory_space<vmem>>, %arg15: memref<8x8x128xf32, #tpu.memory_space<vmem>>) attributes {dimension_semantics = [#tpu.dimension_semantics<arbitrary>], iteration_bounds = array<i64: 1>, scalar_prefetch = 0 : i64, scratch_operands = 3 : i64, tpu.core_type = #tpu.core_type<tc>, window_params = [{transform_indices = @transform_0, window_bounds = array<i64: 8, 8, 128>}, {pipeline_mode = #tpu.pipeline_mode<synchronous>, transform_indices = @transform_1, window_bounds = array<i64: 128, 128>}, {pipeline_mode = #tpu.pipeline_mode<synchronous>, transform_indices = @transform_2, window_bounds = array<i64: 128, 128>}, {pipeline_mode = #tpu.pipeline_mode<synchronous>, transform_indices = @transform_3, window_bounds = array<i64: 1, 128>}, {pipeline_mode = #tpu.pipeline_mode<synchronous>, transform_indices = @transform_4, window_bounds = array<i64: 128, 128>}, {pipeline_mode = #tpu.pipeline_mode<synchronous>, transform_indices = @transform_5, window_bounds = array<i64: 128, 128>}, {pipeline_mode = #tpu.pipeline_mode<synchronous>, transform_indices = @transform_6, window_bounds = array<i64: 1, 128>}, {pipeline_mode = #tpu.pipeline_mode<synchronous>, transform_indices = @transform_7, window_bounds = array<i64: 128, 128>}, {pipeline_mode = #tpu.pipeline_mode<synchronous>, transform_indices = @transform_8, window_bounds = array<i64: 1, 128>}, {pipeline_mode = #tpu.pipeline_mode<synchronous>, transform_indices = @transform_9, window_bounds = array<i64: 128, 128>}, {pipeline_mode = #tpu.pipeline_mode<synchronous>, transform_indices = @transform_10, window_bounds = array<i64: 1, 128>}, {pipeline_mode = #tpu.pipeline_mode<synchronous>, transform_indices = @transform_11, window_bounds = array<i64: 8, 128>}]} {
    %c0_i32 = arith.constant 0 : i32
    %0 = arith.cmpi eq, %arg0, %c0_i32 : i32
    %1 = arith.extui %0 : i1 to i32
    %c0_i32_0 = arith.constant 0 : i32
    %2 = arith.cmpi ne, %1, %c0_i32_0 : i32
    scf.if %2 {
      %cst_111 = arith.constant 0.000000e+00 : f32
      %126 = vector.broadcast %cst_111 : f32 to vector<8x128xf32>
      %c0_112 = arith.constant 0 : index
      %c0_113 = arith.constant 0 : index
      %127 = vector.load %arg13[%c0_112, %c0_113] : memref<8x128xf32, #tpu.memory_space<vmem>>, vector<8x128xf32>
      tpu.vector_store %arg13[%c0_112, %c0_113], %126 {strides = array<i32>} : memref<8x128xf32, #tpu.memory_space<vmem>>, vector<8x128xf32>,
      %cst_114 = arith.constant 0.000000e+00 : f32
      %128 = vector.broadcast %cst_114 : f32 to vector<8x128xf32>
      %c0_115 = arith.constant 0 : index
      %c0_116 = arith.constant 0 : index
      %129 = vector.load %arg14[%c0_115, %c0_116] : memref<8x128xf32, #tpu.memory_space<vmem>>, vector<8x128xf32>
      tpu.vector_store %arg14[%c0_115, %c0_116], %128 {strides = array<i32>} : memref<8x128xf32, #tpu.memory_space<vmem>>, vector<8x128xf32>,
    } else {
    }
    %c0 = arith.constant 0 : index
    %c0_1 = arith.constant 0 : index
    %c0_2 = arith.constant 0 : index
    %3 = vector.load %arg1[%c0, %c0_1, %c0_2] : memref<8x8x128xf32, #tpu.memory_space<vmem>>, vector<8x8x128xf32>
    %4 = vector.shape_cast %3 : vector<8x8x128xf32> to vector<64x128xf32>
    %c0_3 = arith.constant 0 : index
    %c0_4 = arith.constant 0 : index
    %5 = vector.load %arg2[%c0_3, %c0_4] : memref<128x128xf32, #tpu.memory_space<vmem>>, vector<128x128xf32>
    %cst = arith.constant dense<0.000000e+00> : vector<64x128xf32>
    %6 = tpu.matmul %4, %5, %cst {dimension_numbers = #tpu.dot_dimension_numbers<[1], [0], [0], [1], [0, 0, 1, 1], [], []>} : vector<64x128xf32>, vector<128x128xf32>, vector<64x128xf32> -> vector<64x128xf32>
    %c0_5 = arith.constant 0 : index
    %c0_6 = arith.constant 0 : index
    %7 = vector.load %arg4[%c0_5, %c0_6] : memref<1x128xf32, #tpu.memory_space<vmem>>, vector<1x128xf32>
    %8 = vector.broadcast %7 : vector<1x128xf32> to vector<64x128xf32>
    %9 = arith.addf %6, %8 : vector<64x128xf32>
    %10 = vector.shape_cast %9 : vector<64x128xf32> to vector<8x8x128xf32>
    %c0_7 = arith.constant 0 : index
    %c0_8 = arith.constant 0 : index
    %c0_9 = arith.constant 0 : index
    %11 = vector.load %arg15[%c0_7, %c0_8, %c0_9] : memref<8x8x128xf32, #tpu.memory_space<vmem>>, vector<8x8x128xf32>
    tpu.vector_store %arg15[%c0_7, %c0_8, %c0_9], %10 {strides = array<i32>} : memref<8x8x128xf32, #tpu.memory_space<vmem>>, vector<8x8x128xf32>,
    %c0_10 = arith.constant 0 : index
    %c0_11 = arith.constant 0 : index
    %12 = vector.load %arg7[%c0_10, %c0_11] : memref<1x128xf32, #tpu.memory_space<vmem>>, vector<1x128xf32>
    %13 = vector.shape_cast %12 : vector<1x128xf32> to vector<1x128xf32>
    %14 = vector.broadcast %13 : vector<1x128xf32> to vector<8x128xf32>
    %c0_12 = arith.constant 0 : index
    %c0_13 = arith.constant 0 : index
    %15 = vector.load %arg13[%c0_12, %c0_13] : memref<8x128xf32, #tpu.memory_space<vmem>>, vector<8x128xf32>
    %c0_14 = arith.constant 0 : index
    %c0_15 = arith.constant 0 : index
    %16 = vector.load %arg14[%c0_14, %c0_15] : memref<8x128xf32, #tpu.memory_space<vmem>>, vector<8x128xf32>
    %c0_16 = arith.constant 0 : index
    %c0_17 = arith.constant 0 : index
    %17 = vector.load %arg6[%c0_16, %c0_17] : memref<128x128xf32, #tpu.memory_space<vmem>>, vector<128x128xf32>
    %cst_18 = arith.constant dense<0.000000e+00> : vector<8x128xf32>
    %18 = tpu.matmul %16, %17, %cst_18 {dimension_numbers = #tpu.dot_dimension_numbers<[1], [0], [0], [1], [0, 0, 1, 1], [], []>} : vector<8x128xf32>, vector<128x128xf32>, vector<8x128xf32> -> vector<8x128xf32>
    %c0_19 = arith.constant 0 : index
    %c0_20 = arith.constant 0 : index
    %19 = vector.load %arg3[%c0_19, %c0_20] : memref<128x128xf32, #tpu.memory_space<vmem>>, vector<128x128xf32>
    %cst_21 = arith.constant dense<0.000000e+00> : vector<8x128xf32>
    %20 = tpu.matmul %15, %19, %cst_21 {dimension_numbers = #tpu.dot_dimension_numbers<[1], [0], [0], [1], [0, 0, 1, 1], [], []>} : vector<8x128xf32>, vector<128x128xf32>, vector<8x128xf32> -> vector<8x128xf32>
    %c0_22 = arith.constant 0 : index
    %c0_23 = arith.constant 0 : index
    %c0_24 = arith.constant 0 : index
    %21 = vector.load %arg15[%c0_22, %c0_23, %c0_24] : memref<8x8x128xf32, #tpu.memory_space<vmem>>, vector<1x8x128xf32>
    %22 = vector.shape_cast %21 : vector<1x8x128xf32> to vector<8x128xf32>
    %23 = arith.addf %20, %22 : vector<8x128xf32>
    %24 = math.tanh %23 : vector<8x128xf32>
    %c0_25 = arith.constant 0 : index
    %c0_26 = arith.constant 0 : index
    %25 = vector.load %arg5[%c0_25, %c0_26] : memref<128x128xf32, #tpu.memory_space<vmem>>, vector<128x128xf32>
    %cst_27 = arith.constant dense<0.000000e+00> : vector<8x128xf32>
    %26 = tpu.matmul %24, %25, %cst_27 {dimension_numbers = #tpu.dot_dimension_numbers<[1], [0], [0], [1], [0, 0, 1, 1], [], []>} : vector<8x128xf32>, vector<128x128xf32>, vector<8x128xf32> -> vector<8x128xf32>
    %27 = arith.addf %26, %18 : vector<8x128xf32>
    %28 = arith.addf %27, %14 : vector<8x128xf32>
    %29 = math.tanh %28 : vector<8x128xf32>
    %c0_28 = arith.constant 0 : index
    %c0_29 = arith.constant 0 : index
    %30 = vector.load %arg6[%c0_28, %c0_29] : memref<128x128xf32, #tpu.memory_space<vmem>>, vector<128x128xf32>
    %cst_30 = arith.constant dense<0.000000e+00> : vector<8x128xf32>
    %31 = tpu.matmul %29, %30, %cst_30 {dimension_numbers = #tpu.dot_dimension_numbers<[1], [0], [0], [1], [0, 0, 1, 1], [], []>} : vector<8x128xf32>, vector<128x128xf32>, vector<8x128xf32> -> vector<8x128xf32>
    %c0_31 = arith.constant 0 : index
    %c0_32 = arith.constant 0 : index
    %32 = vector.load %arg3[%c0_31, %c0_32] : memref<128x128xf32, #tpu.memory_space<vmem>>, vector<128x128xf32>
    %cst_33 = arith.constant dense<0.000000e+00> : vector<8x128xf32>
    %33 = tpu.matmul %24, %32, %cst_33 {dimension_numbers = #tpu.dot_dimension_numbers<[1], [0], [0], [1], [0, 0, 1, 1], [], []>} : vector<8x128xf32>, vector<128x128xf32>, vector<8x128xf32> -> vector<8x128xf32>
    %c1 = arith.constant 1 : index
    %c0_34 = arith.constant 0 : index
    %c0_35 = arith.constant 0 : index
    %34 = vector.load %arg15[%c1, %c0_34, %c0_35] : memref<8x8x128xf32, #tpu.memory_space<vmem>>, vector<1x8x128xf32>
    %35 = vector.shape_cast %34 : vector<1x8x128xf32> to vector<8x128xf32>
    %36 = arith.addf %33, %35 : vector<8x128xf32>
    %37 = math.tanh %36 : vector<8x128xf32>
    %c0_36 = arith.constant 0 : index
    %c0_37 = arith.constant 0 : index
    %38 = vector.load %arg5[%c0_36, %c0_37] : memref<128x128xf32, #tpu.memory_space<vmem>>, vector<128x128xf32>
    %cst_38 = arith.constant dense<0.000000e+00> : vector<8x128xf32>
    %39 = tpu.matmul %37, %38, %cst_38 {dimension_numbers = #tpu.dot_dimension_numbers<[1], [0], [0], [1], [0, 0, 1, 1], [], []>} : vector<8x128xf32>, vector<128x128xf32>, vector<8x128xf32> -> vector<8x128xf32>
    %40 = arith.addf %39, %31 : vector<8x128xf32>
    %41 = arith.addf %40, %14 : vector<8x128xf32>
    %42 = math.tanh %41 : vector<8x128xf32>
    %c0_39 = arith.constant 0 : index
    %c0_40 = arith.constant 0 : index
    %43 = vector.load %arg6[%c0_39, %c0_40] : memref<128x128xf32, #tpu.memory_space<vmem>>, vector<128x128xf32>
    %cst_41 = arith.constant dense<0.000000e+00> : vector<8x128xf32>
    %44 = tpu.matmul %42, %43, %cst_41 {dimension_numbers = #tpu.dot_dimension_numbers<[1], [0], [0], [1], [0, 0, 1, 1], [], []>} : vector<8x128xf32>, vector<128x128xf32>, vector<8x128xf32> -> vector<8x128xf32>
    %c0_42 = arith.constant 0 : index
    %c0_43 = arith.constant 0 : index
    %45 = vector.load %arg3[%c0_42, %c0_43] : memref<128x128xf32, #tpu.memory_space<vmem>>, vector<128x128xf32>
    %cst_44 = arith.constant dense<0.000000e+00> : vector<8x128xf32>
    %46 = tpu.matmul %37, %45, %cst_44 {dimension_numbers = #tpu.dot_dimension_numbers<[1], [0], [0], [1], [0, 0, 1, 1], [], []>} : vector<8x128xf32>, vector<128x128xf32>, vector<8x128xf32> -> vector<8x128xf32>
    %c2 = arith.constant 2 : index
    %c0_45 = arith.constant 0 : index
    %c0_46 = arith.constant 0 : index
    %47 = vector.load %arg15[%c2, %c0_45, %c0_46] : memref<8x8x128xf32, #tpu.memory_space<vmem>>, vector<1x8x128xf32>
    %48 = vector.shape_cast %47 : vector<1x8x128xf32> to vector<8x128xf32>
    %49 = arith.addf %46, %48 : vector<8x128xf32>
    %50 = math.tanh %49 : vector<8x128xf32>
    %c0_47 = arith.constant 0 : index
    %c0_48 = arith.constant 0 : index
    %51 = vector.load %arg5[%c0_47, %c0_48] : memref<128x128xf32, #tpu.memory_space<vmem>>, vector<128x128xf32>
    %cst_49 = arith.constant dense<0.000000e+00> : vector<8x128xf32>
    %52 = tpu.matmul %50, %51, %cst_49 {dimension_numbers = #tpu.dot_dimension_numbers<[1], [0], [0], [1], [0, 0, 1, 1], [], []>} : vector<8x128xf32>, vector<128x128xf32>, vector<8x128xf32> -> vector<8x128xf32>
    %53 = arith.addf %52, %44 : vector<8x128xf32>
    %54 = arith.addf %53, %14 : vector<8x128xf32>
    %55 = math.tanh %54 : vector<8x128xf32>
    %c0_50 = arith.constant 0 : index
    %c0_51 = arith.constant 0 : index
    %56 = vector.load %arg6[%c0_50, %c0_51] : memref<128x128xf32, #tpu.memory_space<vmem>>, vector<128x128xf32>
    %cst_52 = arith.constant dense<0.000000e+00> : vector<8x128xf32>
    %57 = tpu.matmul %55, %56, %cst_52 {dimension_numbers = #tpu.dot_dimension_numbers<[1], [0], [0], [1], [0, 0, 1, 1], [], []>} : vector<8x128xf32>, vector<128x128xf32>, vector<8x128xf32> -> vector<8x128xf32>
    %c0_53 = arith.constant 0 : index
    %c0_54 = arith.constant 0 : index
    %58 = vector.load %arg3[%c0_53, %c0_54] : memref<128x128xf32, #tpu.memory_space<vmem>>, vector<128x128xf32>
    %cst_55 = arith.constant dense<0.000000e+00> : vector<8x128xf32>
    %59 = tpu.matmul %50, %58, %cst_55 {dimension_numbers = #tpu.dot_dimension_numbers<[1], [0], [0], [1], [0, 0, 1, 1], [], []>} : vector<8x128xf32>, vector<128x128xf32>, vector<8x128xf32> -> vector<8x128xf32>
    %c3 = arith.constant 3 : index
    %c0_56 = arith.constant 0 : index
    %c0_57 = arith.constant 0 : index
    %60 = vector.load %arg15[%c3, %c0_56, %c0_57] : memref<8x8x128xf32, #tpu.memory_space<vmem>>, vector<1x8x128xf32>
    %61 = vector.shape_cast %60 : vector<1x8x128xf32> to vector<8x128xf32>
    %62 = arith.addf %59, %61 : vector<8x128xf32>
    %63 = math.tanh %62 : vector<8x128xf32>
    %c0_58 = arith.constant 0 : index
    %c0_59 = arith.constant 0 : index
    %64 = vector.load %arg5[%c0_58, %c0_59] : memref<128x128xf32, #tpu.memory_space<vmem>>, vector<128x128xf32>
    %cst_60 = arith.constant dense<0.000000e+00> : vector<8x128xf32>
    %65 = tpu.matmul %63, %64, %cst_60 {dimension_numbers = #tpu.dot_dimension_numbers<[1], [0], [0], [1], [0, 0, 1, 1], [], []>} : vector<8x128xf32>, vector<128x128xf32>, vector<8x128xf32> -> vector<8x128xf32>
    %66 = arith.addf %65, %57 : vector<8x128xf32>
    %67 = arith.addf %66, %14 : vector<8x128xf32>
    %68 = math.tanh %67 : vector<8x128xf32>
    %c0_61 = arith.constant 0 : index
    %c0_62 = arith.constant 0 : index
    %69 = vector.load %arg6[%c0_61, %c0_62] : memref<128x128xf32, #tpu.memory_space<vmem>>, vector<128x128xf32>
    %cst_63 = arith.constant dense<0.000000e+00> : vector<8x128xf32>
    %70 = tpu.matmul %68, %69, %cst_63 {dimension_numbers = #tpu.dot_dimension_numbers<[1], [0], [0], [1], [0, 0, 1, 1], [], []>} : vector<8x128xf32>, vector<128x128xf32>, vector<8x128xf32> -> vector<8x128xf32>
    %c0_64 = arith.constant 0 : index
    %c0_65 = arith.constant 0 : index
    %71 = vector.load %arg3[%c0_64, %c0_65] : memref<128x128xf32, #tpu.memory_space<vmem>>, vector<128x128xf32>
    %cst_66 = arith.constant dense<0.000000e+00> : vector<8x128xf32>
    %72 = tpu.matmul %63, %71, %cst_66 {dimension_numbers = #tpu.dot_dimension_numbers<[1], [0], [0], [1], [0, 0, 1, 1], [], []>} : vector<8x128xf32>, vector<128x128xf32>, vector<8x128xf32> -> vector<8x128xf32>
    %c4 = arith.constant 4 : index
    %c0_67 = arith.constant 0 : index
    %c0_68 = arith.constant 0 : index
    %73 = vector.load %arg15[%c4, %c0_67, %c0_68] : memref<8x8x128xf32, #tpu.memory_space<vmem>>, vector<1x8x128xf32>
    %74 = vector.shape_cast %73 : vector<1x8x128xf32> to vector<8x128xf32>
    %75 = arith.addf %72, %74 : vector<8x128xf32>
    %76 = math.tanh %75 : vector<8x128xf32>
    %c0_69 = arith.constant 0 : index
    %c0_70 = arith.constant 0 : index
    %77 = vector.load %arg5[%c0_69, %c0_70] : memref<128x128xf32, #tpu.memory_space<vmem>>, vector<128x128xf32>
    %cst_71 = arith.constant dense<0.000000e+00> : vector<8x128xf32>
    %78 = tpu.matmul %76, %77, %cst_71 {dimension_numbers = #tpu.dot_dimension_numbers<[1], [0], [0], [1], [0, 0, 1, 1], [], []>} : vector<8x128xf32>, vector<128x128xf32>, vector<8x128xf32> -> vector<8x128xf32>
    %79 = arith.addf %78, %70 : vector<8x128xf32>
    %80 = arith.addf %79, %14 : vector<8x128xf32>
    %81 = math.tanh %80 : vector<8x128xf32>
    %c0_72 = arith.constant 0 : index
    %c0_73 = arith.constant 0 : index
    %82 = vector.load %arg6[%c0_72, %c0_73] : memref<128x128xf32, #tpu.memory_space<vmem>>, vector<128x128xf32>
    %cst_74 = arith.constant dense<0.000000e+00> : vector<8x128xf32>
    %83 = tpu.matmul %81, %82, %cst_74 {dimension_numbers = #tpu.dot_dimension_numbers<[1], [0], [0], [1], [0, 0, 1, 1], [], []>} : vector<8x128xf32>, vector<128x128xf32>, vector<8x128xf32> -> vector<8x128xf32>
    %c0_75 = arith.constant 0 : index
    %c0_76 = arith.constant 0 : index
    %84 = vector.load %arg3[%c0_75, %c0_76] : memref<128x128xf32, #tpu.memory_space<vmem>>, vector<128x128xf32>
    %cst_77 = arith.constant dense<0.000000e+00> : vector<8x128xf32>
    %85 = tpu.matmul %76, %84, %cst_77 {dimension_numbers = #tpu.dot_dimension_numbers<[1], [0], [0], [1], [0, 0, 1, 1], [], []>} : vector<8x128xf32>, vector<128x128xf32>, vector<8x128xf32> -> vector<8x128xf32>
    %c5 = arith.constant 5 : index
    %c0_78 = arith.constant 0 : index
    %c0_79 = arith.constant 0 : index
    %86 = vector.load %arg15[%c5, %c0_78, %c0_79] : memref<8x8x128xf32, #tpu.memory_space<vmem>>, vector<1x8x128xf32>
    %87 = vector.shape_cast %86 : vector<1x8x128xf32> to vector<8x128xf32>
    %88 = arith.addf %85, %87 : vector<8x128xf32>
    %89 = math.tanh %88 : vector<8x128xf32>
    %c0_80 = arith.constant 0 : index
    %c0_81 = arith.constant 0 : index
    %90 = vector.load %arg5[%c0_80, %c0_81] : memref<128x128xf32, #tpu.memory_space<vmem>>, vector<128x128xf32>
    %cst_82 = arith.constant dense<0.000000e+00> : vector<8x128xf32>
    %91 = tpu.matmul %89, %90, %cst_82 {dimension_numbers = #tpu.dot_dimension_numbers<[1], [0], [0], [1], [0, 0, 1, 1], [], []>} : vector<8x128xf32>, vector<128x128xf32>, vector<8x128xf32> -> vector<8x128xf32>
    %92 = arith.addf %91, %83 : vector<8x128xf32>
    %93 = arith.addf %92, %14 : vector<8x128xf32>
    %94 = math.tanh %93 : vector<8x128xf32>
    %c0_83 = arith.constant 0 : index
    %c0_84 = arith.constant 0 : index
    %95 = vector.load %arg6[%c0_83, %c0_84] : memref<128x128xf32, #tpu.memory_space<vmem>>, vector<128x128xf32>
    %cst_85 = arith.constant dense<0.000000e+00> : vector<8x128xf32>
    %96 = tpu.matmul %94, %95, %cst_85 {dimension_numbers = #tpu.dot_dimension_numbers<[1], [0], [0], [1], [0, 0, 1, 1], [], []>} : vector<8x128xf32>, vector<128x128xf32>, vector<8x128xf32> -> vector<8x128xf32>
    %c0_86 = arith.constant 0 : index
    %c0_87 = arith.constant 0 : index
    %97 = vector.load %arg3[%c0_86, %c0_87] : memref<128x128xf32, #tpu.memory_space<vmem>>, vector<128x128xf32>
    %cst_88 = arith.constant dense<0.000000e+00> : vector<8x128xf32>
    %98 = tpu.matmul %89, %97, %cst_88 {dimension_numbers = #tpu.dot_dimension_numbers<[1], [0], [0], [1], [0, 0, 1, 1], [], []>} : vector<8x128xf32>, vector<128x128xf32>, vector<8x128xf32> -> vector<8x128xf32>
    %c6 = arith.constant 6 : index
    %c0_89 = arith.constant 0 : index
    %c0_90 = arith.constant 0 : index
    %99 = vector.load %arg15[%c6, %c0_89, %c0_90] : memref<8x8x128xf32, #tpu.memory_space<vmem>>, vector<1x8x128xf32>
    %100 = vector.shape_cast %99 : vector<1x8x128xf32> to vector<8x128xf32>
    %101 = arith.addf %98, %100 : vector<8x128xf32>
    %102 = math.tanh %101 : vector<8x128xf32>
    %c0_91 = arith.constant 0 : index
    %c0_92 = arith.constant 0 : index
    %103 = vector.load %arg5[%c0_91, %c0_92] : memref<128x128xf32, #tpu.memory_space<vmem>>, vector<128x128xf32>
    %cst_93 = arith.constant dense<0.000000e+00> : vector<8x128xf32>
    %104 = tpu.matmul %102, %103, %cst_93 {dimension_numbers = #tpu.dot_dimension_numbers<[1], [0], [0], [1], [0, 0, 1, 1], [], []>} : vector<8x128xf32>, vector<128x128xf32>, vector<8x128xf32> -> vector<8x128xf32>
    %105 = arith.addf %104, %96 : vector<8x128xf32>
    %106 = arith.addf %105, %14 : vector<8x128xf32>
    %107 = math.tanh %106 : vector<8x128xf32>
    %c0_94 = arith.constant 0 : index
    %c0_95 = arith.constant 0 : index
    %108 = vector.load %arg6[%c0_94, %c0_95] : memref<128x128xf32, #tpu.memory_space<vmem>>, vector<128x128xf32>
    %cst_96 = arith.constant dense<0.000000e+00> : vector<8x128xf32>
    %109 = tpu.matmul %107, %108, %cst_96 {dimension_numbers = #tpu.dot_dimension_numbers<[1], [0], [0], [1], [0, 0, 1, 1], [], []>} : vector<8x128xf32>, vector<128x128xf32>, vector<8x128xf32> -> vector<8x128xf32>
    %c0_97 = arith.constant 0 : index
    %c0_98 = arith.constant 0 : index
    %110 = vector.load %arg3[%c0_97, %c0_98] : memref<128x128xf32, #tpu.memory_space<vmem>>, vector<128x128xf32>
    %cst_99 = arith.constant dense<0.000000e+00> : vector<8x128xf32>
    %111 = tpu.matmul %102, %110, %cst_99 {dimension_numbers = #tpu.dot_dimension_numbers<[1], [0], [0], [1], [0, 0, 1, 1], [], []>} : vector<8x128xf32>, vector<128x128xf32>, vector<8x128xf32> -> vector<8x128xf32>
    %c7 = arith.constant 7 : index
    %c0_100 = arith.constant 0 : index
    %c0_101 = arith.constant 0 : index
    %112 = vector.load %arg15[%c7, %c0_100, %c0_101] : memref<8x8x128xf32, #tpu.memory_space<vmem>>, vector<1x8x128xf32>
    %113 = vector.shape_cast %112 : vector<1x8x128xf32> to vector<8x128xf32>
    %114 = arith.addf %111, %113 : vector<8x128xf32>
    %115 = math.tanh %114 : vector<8x128xf32>
    %c0_102 = arith.constant 0 : index
    %c0_103 = arith.constant 0 : index
    %116 = vector.load %arg5[%c0_102, %c0_103] : memref<128x128xf32, #tpu.memory_space<vmem>>, vector<128x128xf32>
    %cst_104 = arith.constant dense<0.000000e+00> : vector<8x128xf32>
    %117 = tpu.matmul %115, %116, %cst_104 {dimension_numbers = #tpu.dot_dimension_numbers<[1], [0], [0], [1], [0, 0, 1, 1], [], []>} : vector<8x128xf32>, vector<128x128xf32>, vector<8x128xf32> -> vector<8x128xf32>
    %118 = arith.addf %117, %109 : vector<8x128xf32>
    %119 = arith.addf %118, %14 : vector<8x128xf32>
    %120 = math.tanh %119 : vector<8x128xf32>
    %c0_105 = arith.constant 0 : index
    %c0_106 = arith.constant 0 : index
    %121 = vector.load %arg13[%c0_105, %c0_106] : memref<8x128xf32, #tpu.memory_space<vmem>>, vector<8x128xf32>
    tpu.vector_store %arg13[%c0_105, %c0_106], %115 {strides = array<i32>} : memref<8x128xf32, #tpu.memory_space<vmem>>, vector<8x128xf32>,
    %c0_107 = arith.constant 0 : index
    %c0_108 = arith.constant 0 : index
    %122 = vector.load %arg14[%c0_107, %c0_108] : memref<8x128xf32, #tpu.memory_space<vmem>>, vector<8x128xf32>
    tpu.vector_store %arg14[%c0_107, %c0_108], %120 {strides = array<i32>} : memref<8x128xf32, #tpu.memory_space<vmem>>, vector<8x128xf32>,
    %c0_i32_109 = arith.constant 0 : i32
    %123 = arith.cmpi eq, %arg0, %c0_i32_109 : i32
    %124 = arith.extui %123 : i1 to i32
    %c0_i32_110 = arith.constant 0 : i32
    %125 = arith.cmpi ne, %124, %c0_i32_110 : i32
    scf.if %125 {
      %c0_111 = arith.constant 0 : index
      %c0_112 = arith.constant 0 : index
      %126 = vector.load %arg8[%c0_111, %c0_112] : memref<128x128xf32, #tpu.memory_space<vmem>>, vector<128x128xf32>
      %cst_113 = arith.constant dense<0.000000e+00> : vector<8x128xf32>
      %127 = tpu.matmul %120, %126, %cst_113 {dimension_numbers = #tpu.dot_dimension_numbers<[1], [0], [0], [1], [0, 0, 1, 1], [], []>} : vector<8x128xf32>, vector<128x128xf32>, vector<8x128xf32> -> vector<8x128xf32>
      %c0_114 = arith.constant 0 : index
      %c0_115 = arith.constant 0 : index
      %128 = vector.load %arg9[%c0_114, %c0_115] : memref<1x128xf32, #tpu.memory_space<vmem>>, vector<1x128xf32>
      %129 = vector.broadcast %128 : vector<1x128xf32> to vector<8x128xf32>
      %130 = arith.addf %127, %129 : vector<8x128xf32>
      %cst_116 = arith.constant 0.000000e+00 : f32
      %131 = vector.broadcast %cst_116 : f32 to vector<8x128xf32>
      %132 = arith.maximumf %130, %131 : vector<8x128xf32>
      %c0_117 = arith.constant 0 : index
      %c0_118 = arith.constant 0 : index
      %133 = vector.load %arg10[%c0_117, %c0_118] : memref<128x128xf32, #tpu.memory_space<vmem>>, vector<128x128xf32>
      %cst_119 = arith.constant dense<0.000000e+00> : vector<8x128xf32>
      %134 = tpu.matmul %132, %133, %cst_119 {dimension_numbers = #tpu.dot_dimension_numbers<[1], [0], [0], [1], [0, 0, 1, 1], [], []>} : vector<8x128xf32>, vector<128x128xf32>, vector<8x128xf32> -> vector<8x128xf32>
      %c0_120 = arith.constant 0 : index
      %c0_121 = arith.constant 0 : index
      %135 = vector.load %arg11[%c0_120, %c0_121] : memref<1x128xf32, #tpu.memory_space<vmem>>, vector<1x128xf32>
      %136 = vector.broadcast %135 : vector<1x128xf32> to vector<8x128xf32>
      %137 = arith.addf %134, %136 : vector<8x128xf32>
      %c0_122 = arith.constant 0 : index
      %c0_123 = arith.constant 0 : index
      %138 = vector.load %arg12[%c0_122, %c0_123] : memref<8x128xf32, #tpu.memory_space<vmem>>, vector<8x128xf32>
      tpu.vector_store %arg12[%c0_122, %c0_123], %137 {strides = array<i32>} : memref<8x128xf32, #tpu.memory_space<vmem>>, vector<8x128xf32>,
    } else {
    }
    return
  }
  func.func @transform_0(%arg0: i32) -> (i32, i32, i32) {
    %c0_i32 = arith.constant 0 : i32
    %c0_i32_0 = arith.constant 0 : i32
    %c0_i32_1 = arith.constant 0 : i32
    return %arg0, %c0_i32, %c0_i32_0 : i32, i32, i32
  }
  func.func @transform_1(%arg0: i32) -> (i32, i32) {
    %c0_i32 = arith.constant 0 : i32
    %c0_i32_0 = arith.constant 0 : i32
    %c0_i32_1 = arith.constant 0 : i32
    return %c0_i32, %c0_i32_0 : i32, i32
  }
  func.func @transform_2(%arg0: i32) -> (i32, i32) {
    %c0_i32 = arith.constant 0 : i32
    %c0_i32_0 = arith.constant 0 : i32
    %c0_i32_1 = arith.constant 0 : i32
    return %c0_i32, %c0_i32_0 : i32, i32
  }
  func.func @transform_3(%arg0: i32) -> (i32, i32) {
    %c0_i32 = arith.constant 0 : i32
    %c0_i32_0 = arith.constant 0 : i32
    %c0_i32_1 = arith.constant 0 : i32
    return %c0_i32, %c0_i32_0 : i32, i32
  }
  func.func @transform_4(%arg0: i32) -> (i32, i32) {
    %c0_i32 = arith.constant 0 : i32
    %c0_i32_0 = arith.constant 0 : i32
    %c0_i32_1 = arith.constant 0 : i32
    return %c0_i32, %c0_i32_0 : i32, i32
  }
  func.func @transform_5(%arg0: i32) -> (i32, i32) {
    %c0_i32 = arith.constant 0 : i32
    %c0_i32_0 = arith.constant 0 : i32
    %c0_i32_1 = arith.constant 0 : i32
    return %c0_i32, %c0_i32_0 : i32, i32
  }
  func.func @transform_6(%arg0: i32) -> (i32, i32) {
    %c0_i32 = arith.constant 0 : i32
    %c0_i32_0 = arith.constant 0 : i32
    %c0_i32_1 = arith.constant 0 : i32
    return %c0_i32, %c0_i32_0 : i32, i32
  }
  func.func @transform_7(%arg0: i32) -> (i32, i32) {
    %c0_i32 = arith.constant 0 : i32
    %c0_i32_0 = arith.constant 0 : i32
    %c0_i32_1 = arith.constant 0 : i32
    return %c0_i32, %c0_i32_0 : i32, i32
  }
  func.func @transform_8(%arg0: i32) -> (i32, i32) {
    %c0_i32 = arith.constant 0 : i32
    %c0_i32_0 = arith.constant 0 : i32
    %c0_i32_1 = arith.constant 0 : i32
    return %c0_i32, %c0_i32_0 : i32, i32
  }
  func.func @transform_9(%arg0: i32) -> (i32, i32) {
    %c0_i32 = arith.constant 0 : i32
    %c0_i32_0 = arith.constant 0 : i32
    %c0_i32_1 = arith.constant 0 : i32
    return %c0_i32, %c0_i32_0 : i32, i32
  }
  func.func @transform_10(%arg0: i32) -> (i32, i32) {
    %c0_i32 = arith.constant 0 : i32
    %c0_i32_0 = arith.constant 0 : i32
    %c0_i32_1 = arith.constant 0 : i32
    return %c0_i32, %c0_i32_0 : i32, i32
  }
  func.func @transform_11(%arg0: i32) -> (i32, i32) {
    %c0_i32 = arith.constant 0 : i32
    %c0_i32_0 = arith.constant 0 : i32
    %c0_i32_1 = arith.constant 0 : i32
    return %c0_i32, %c0_i32_0 : i32, i32
  }
}

</mosaic_0001>

<bundles_post_ra>
// kernel: tpu_custom_call.1
= control target key start
LH: loop header
LB: loop body
LE: loop exit
PB: predicated region body
PF: predicated region fallthrough
CT: control target
= control target key end

     0   :  { %16 = vsyncpa [#allocation6], 0  ;;  %s5338_s0 = inlined_call_operand.hbm [shape: f32[8,8,128], index: 0, kind: input, shape index: {}]   ;;  %s5339_s1 = inlined_call_operand.hbm [shape: f32[128,128], index: 1, kind: input, shape index: {}]   ;;  %s5340_s2 = inlined_call_operand.hbm [shape: f32[128,128], index: 2, kind: input, shape index: {}]   ;;  %s5341_s3 = inlined_call_operand.vmem [shape: f32[1,128], index: 3, kind: input, shape index: {}]   ;;  %s5342_s4 = inlined_call_operand.hbm [shape: f32[128,128], index: 4, kind: input, shape index: {}]   ;;  %s5343_s5 = inlined_call_operand.hbm [shape: f32[128,128], index: 5, kind: input, shape index: {}]   ;;  %s5344_s6 = inlined_call_operand.vmem [shape: f32[1,128], index: 6, kind: input, shape index: {}]   ;;  %s5345_s7 = inlined_call_operand.hbm [shape: f32[128,128], index: 7, kind: input, shape index: {}]   ;;  %s5346_s8 = inlined_call_operand.vmem [shape: f32[1,128], index: 8, kind: input, shape index: {}]   ;;  %s5347_s9 = inlined_call_operand.hbm [shape: f32[128,128], index: 9, kind: input, shape index: {}]   ;;  %s5348_s10 = inlined_call_operand.vmem [shape: f32[1,128], index: 10, kind: input, shape index: {}]   ;;  %s5349_s11 = inlined_call_operand.hbm [shape: f32[8,128], index: 11, kind: output, shape index: {}]  }
   0x1   :  { %17 = vsyncpa [#allocation9], 0 }
   0x2   :  { %18 = vsyncpa [#allocation12], 0 }
   0x3   :  { %19 = vsyncpa [#allocation15], 0 }
   0x4   :  { %20 = vsyncpa [#allocation7], 0  ;;  %s4582_s17 = smov [#allocation8]   ;;  %s4583_s19 = smov [#allocation11]  }
   0x5   :  { %s38_s18 = sshll.u32 %s4582_s17, 4  ;;  %s64_s20 = sshll.u32 %s4583_s19, 4  ;;  %s39_s18 = int_to_ptr.vmem [resolvable:$true] %s38_s18  ;;  %s4655_s20 = int_to_ptr.vmem [resolvable:$true] %s64_s20 }
   0x6   :  { %s4396_s23 = scalar_lea.hbm %s5339_s1, 2048 }
   0x7   :  { %p4397_p0 = scmp.ne.s32.totalorder %s5339_s1, %s4396_s23  ;;  %p4400_p1 = scmp.lt.u32.totalorder %s4396_s23, %s5339_s1 }
   0x9   :  { %p4402_p2 = pnand %p4400_p1, %p4397_p0 }
   0xb   :  { %4405 = shalt.err (!%p4402_p2)
}
   0xc   :  { %s4406_s28 = scalar_lea.vmem %s39_s18, 2048  ;;  %p4411_p4 = scmp.lt.s32.totalorder %s39_s18, %s39_s18 }
   0xd   :  { %p4407_p3 = scmp.ne.s32.totalorder %s39_s18, %s4406_s28  ;;  %p4412_p5 = scmp.lt.s32.totalorder %s4406_s28, %s4406_s28 }
   0xf   :  { %p4413_p6 = por %p4412_p5, %p4411_p4 }
  0x11   :  { %p4414_p7 = pnand %p4413_p6, %p4407_p3 }
  0x13   :  { %4417 = shalt.err (!%p4414_p7)
}
  0x14   :  { %s4584_s29 = smov 128   ;;  %s4585_s30 = smov 8  }
  0x15   :  { %44 = dma.hbm_to_vmem [thread:$0]  %s5339_s1, 2048, %s39_s18, [#allocation9], %s4584_s29, %s4584_s29, %s4585_s30  }
  0x16   :  { %s4418_s16 = scalar_lea.hbm %s5342_s4, 2048 }
  0x17   :  { %p4419_p8 = scmp.ne.s32.totalorder %s5342_s4, %s4418_s16  ;;  %p4422_p9 = scmp.lt.u32.totalorder %s4418_s16, %s5342_s4 }
  0x19   :  { %p4424_p10 = pnand %p4422_p9, %p4419_p8 }
  0x1b   :  { %4427 = shalt.err (!%p4424_p10)
}
  0x1c   :  { %s4428_s23 = scalar_lea.vmem %s4655_s20, 2048  ;;  %p4433_p12 = scmp.lt.s32.totalorder %s4655_s20, %s4655_s20 }
  0x1d   :  { %p4429_p11 = scmp.ne.s32.totalorder %s4655_s20, %s4428_s23  ;;  %p4434_p13 = scmp.lt.s32.totalorder %s4428_s23, %s4428_s23 }
  0x1f   :  { %p4435_p0 = por %p4434_p13, %p4433_p12 }
  0x21   :  { %p4436_p1 = pnand %p4435_p0, %p4429_p11 }
  0x23   :  { %4439 = shalt.err (!%p4436_p1)
}
  0x24   :  { %70 = dma.hbm_to_vmem [thread:$0]  %s5342_s4, 2048, %s4655_s20, [#allocation12], %s4584_s29, %s4584_s29, %s4585_s30  }
  0x25   :  { %s4586_s24 = smov [#allocation14]   ;;  %s4587_s26 = smov [#allocation5]  }
  0x26   :  { %s90_s25 = sshll.u32 %s4586_s24, 4  ;;  %s26_s27 = sshll.u32 %s4587_s26, 4  ;;  %s91_s25 = int_to_ptr.vmem [resolvable:$true] %s90_s25  ;;  %s4692_s27 = int_to_ptr.vmem [resolvable:$true] %s26_s27 }
  0x27   :  { %s4440_s13 = scalar_lea.hbm %s5345_s7, 2048 }
  0x28   :  { %p4441_p2 = scmp.ne.s32.totalorder %s5345_s7, %s4440_s13  ;;  %p4444_p3 = scmp.lt.u32.totalorder %s4440_s13, %s5345_s7 }
  0x2a   :  { %p4446_p4 = pnand %p4444_p3, %p4441_p2 }
  0x2c   :  { %4449 = shalt.err (!%p4446_p4)
}
  0x2d   :  { %s4450_s4 = scalar_lea.vmem %s91_s25, 2048  ;;  %p4455_p6 = scmp.lt.s32.totalorder %s91_s25, %s91_s25 }
  0x2e   :  { %p4451_p5 = scmp.ne.s32.totalorder %s91_s25, %s4450_s4  ;;  %p4456_p7 = scmp.lt.s32.totalorder %s4450_s4, %s4450_s4 }
  0x30   :  { %p4457_p8 = por %p4456_p7, %p4455_p6 }
  0x32   :  { %p4458_p9 = pnand %p4457_p8, %p4451_p5 }
  0x34   :  { %4461 = shalt.err (!%p4458_p9)
}
  0x35   :  { %96 = dma.hbm_to_vmem [thread:$0]  %s5345_s7, 2048, %s91_s25, [#allocation15], %s4584_s29, %s4584_s29, %s4585_s30  }
  0x36   :  { %s4462_s23 = scalar_lea.hbm %s5338_s0, 1024 }
  0x37   :  { %p4463_p10 = scmp.ne.s32.totalorder %s5338_s0, %s4462_s23  ;;  %p4466_p11 = scmp.lt.u32.totalorder %s4462_s23, %s5338_s0 }
  0x39   :  { %p4468_p12 = pnand %p4466_p11, %p4463_p10 }
  0x3b   :  { %4471 = shalt.err (!%p4468_p12)
}
  0x3c   :  { %s4472_s28 = scalar_lea.vmem %s4692_s27, 1024  ;;  %p4477_p0 = scmp.lt.s32.totalorder %s4692_s27, %s4692_s27 }
  0x3d   :  { %p4473_p13 = scmp.ne.s32.totalorder %s4692_s27, %s4472_s28  ;;  %p4478_p1 = scmp.lt.s32.totalorder %s4472_s28, %s4472_s28 }
  0x3f   :  { %p4479_p2 = por %p4478_p1, %p4477_p0 }
  0x41   :  { %p4480_p3 = pnand %p4479_p2, %p4473_p13 }
  0x43   :  { %4483 = shalt.err (!%p4480_p3)
}
  0x44   :  { %32 = dma.hbm_to_vmem [thread:$0]  %s5338_s0, 1024, %s4692_s27, [#allocation6], %s4584_s29, %s4584_s29, %s4585_s30  }
  0x45   :  { %s4588_s12 = smov [#allocation10]   ;;  %s4589_s14 = smov [#allocation13]  }
  0x46   :  { %s50_s13 = sshll.u32 %s4588_s12, 4  ;;  %s76_s15 = sshll.u32 %s4589_s14, 4  ;;  %s51_s13 = int_to_ptr.vmem [resolvable:$true] %s50_s13  ;;  %s4729_s15 = int_to_ptr.vmem [resolvable:$true] %s76_s15 }
  0x47   :  { %s4484_s4 = scalar_lea.hbm %s5340_s2, 2048 }
  0x48   :  { %p4485_p4 = scmp.ne.s32.totalorder %s5340_s2, %s4484_s4  ;;  %p4488_p5 = scmp.lt.u32.totalorder %s4484_s4, %s5340_s2 }
  0x4a   :  { %p4490_p6 = pnand %p4488_p5, %p4485_p4 }
  0x4c   :  { %4493 = shalt.err (!%p4490_p6)
}
  0x4d   :  { %s4494_s0 = scalar_lea.vmem %s51_s13, 2048  ;;  %p4499_p8 = scmp.lt.s32.totalorder %s51_s13, %s51_s13 }
  0x4e   :  { %p4495_p7 = scmp.ne.s32.totalorder %s51_s13, %s4494_s0  ;;  %p4500_p9 = scmp.lt.s32.totalorder %s4494_s0, %s4494_s0 }
  0x50   :  { %p4501_p10 = por %p4500_p9, %p4499_p8 }
  0x52   :  { %p4502_p11 = pnand %p4501_p10, %p4495_p7 }
  0x54   :  { %4505 = shalt.err (!%p4502_p11)
}
  0x55   :  { %56 = dma.hbm_to_vmem [thread:$0]  %s5340_s2, 2048, %s51_s13, [#allocation9], %s4584_s29, %s4584_s29, %s4585_s30  }
  0x56   :  { %s4506_s24 = scalar_lea.hbm %s5343_s5, 2048 }
  0x57   :  { %p4507_p12 = scmp.ne.s32.totalorder %s5343_s5, %s4506_s24  ;;  %p4510_p13 = scmp.lt.u32.totalorder %s4506_s24, %s5343_s5 }
  0x59   :  { %p4512_p0 = pnand %p4510_p13, %p4507_p12 }
  0x5b   :  { %4515 = shalt.err (!%p4512_p0)
}
  0x5c   :  { %s4516_s12 = scalar_lea.vmem %s4729_s15, 2048  ;;  %p4521_p2 = scmp.lt.s32.totalorder %s4729_s15, %s4729_s15 }
  0x5d   :  { %p4517_p1 = scmp.ne.s32.totalorder %s4729_s15, %s4516_s12  ;;  %p4522_p3 = scmp.lt.s32.totalorder %s4516_s12, %s4516_s12 }
  0x5f   :  { %p4523_p4 = por %p4522_p3, %p4521_p2 }
  0x61   :  { %p4524_p5 = pnand %p4523_p4, %p4517_p1 }
  0x63   :  { %4527 = shalt.err (!%p4524_p5)
}
  0x64   :  { %82 = dma.hbm_to_vmem [thread:$0]  %s5343_s5, 2048, %s4729_s15, [#allocation12], %s4584_s29, %s4584_s29, %s4585_s30  }
  0x65   :  { %s4590_s14 = smov [#allocation16]   ;;  %s4528_s20 = scalar_lea.hbm %s5347_s9, 2048 }
  0x66   :  { %s104_s16 = sshll.u32 %s4590_s14, 4  ;;  %p4529_p6 = scmp.ne.s32.totalorder %s5347_s9, %s4528_s20  ;;  %s105_s16 = int_to_ptr.vmem [resolvable:$true] %s104_s16 }
  0x67   :  { %p4532_p7 = scmp.lt.u32.totalorder %s4528_s20, %s5347_s9 }
  0x69   :  { %p4534_p8 = pnand %p4532_p7, %p4529_p6 }
  0x6b   :  { %4537 = shalt.err (!%p4534_p8)
}
  0x6c   :  { %s4538_s27 = scalar_lea.vmem %s105_s16, 2048  ;;  %p4543_p10 = scmp.lt.s32.totalorder %s105_s16, %s105_s16 }
  0x6d   :  { %p4539_p9 = scmp.ne.s32.totalorder %s105_s16, %s4538_s27  ;;  %p4544_p11 = scmp.lt.s32.totalorder %s4538_s27, %s4538_s27 }
  0x6f   :  { %p4545_p12 = por %p4544_p11, %p4543_p10 }
  0x71   :  { %p4546_p13 = pnand %p4545_p12, %p4539_p9 }
  0x73   :  { %4549 = shalt.err (!%p4546_p13)
}
  0x74   :  { %110 = dma.hbm_to_vmem [thread:$0]  %s5347_s9, 2048, %s105_s16, [#allocation15], %s4584_s29, %s4584_s29, %s4585_s30  }
  0x75   :  { %4572 = dma.done.wait [#allocation6], 1024  }
  0x76   :  { %4573 = vsyncadd [#allocation6], 4294966272 }
  0x77   :  { %4574 = dma.done.wait [#allocation9], 4096  }
  0x78   :  { %4575 = vsyncadd [#allocation9], 4294963200 }
  0x79   :  { %4576 = dma.done.wait [#allocation12], 4096  }
  0x7a   :  { %4577 = vsyncadd [#allocation12], 4294963200 }
  0x7b   :  { %4578 = dma.done.wait [#allocation15], 4096  }
  0x7c   :  { %4579 = vsyncadd [#allocation15], 4294963200  ;;  %v4591_v0 = vmov 0.0|0.0   ;;  %vm4592_vm0 = vmmov 0   ;;  %v4593_v1 = vmov 0.0   ;;  %v148_v2 = vld [vmem:[#allocation8] sm:$0xff] }
  0x7d   :  { %3727 = vmatprep.subr.bf16.mxu1 %v4591_v0  ;;  %2817 = vmatprep.mubr.msk.f32.mxu1 %vm4592_vm0, %v4593_v1  ;;  %v149_v3 = vld [vmem:[#allocation8 + $0x8] sm:$0xff]  ;;  %v150_v4 = vld [vmem:[#allocation8 + $0x10] sm:$0xff]  ;;  %v151_v6 = vld [vmem:[#allocation8 + $0x18] sm:$0xff]  ;;  %s4594_s24 = smov [#allocation17]  }
  0x7e   :  { %v3695_v5 = vpack.c.bf16 %v149_v3, %v148_v2  ;;  %v3699_v7 = vpack.c.bf16 %v151_v6, %v150_v4  ;;  %v152_v8 = vld [vmem:[#allocation8 + $0x20] sm:$0xff]  ;;  %v153_v9 = vld [vmem:[#allocation8 + $0x28] sm:$0xff]  ;;  %v154_v12 = vld [vmem:[#allocation8 + $0x30] sm:$0xff]  ;;  %s2259_s26 = sshll.u32 %s4594_s24, 4  ;;  %s2260_s26 = int_to_ptr.vmem [resolvable:$true] %s2259_s26 }
  0x7f   :  { %v3703_v10 = vpack.c.bf16 %v153_v9, %v152_v8  ;;  %v140_v11 = vld [vmem:[#allocation5] sm:$0xff]  ;;  %v155_v13 = vld [vmem:[#allocation8 + $0x38] sm:$0xff]  ;;  %v157_v16 = vld [vmem:[#allocation8 + $0x48] sm:$0xff]  ;;  %s4550_s28 = scalar_lea.vmem %s2260_s26, 128  ;;  %p4555_p1 = scmp.lt.s32.totalorder %s2260_s26, %s2260_s26 }
  0x80   :  { %3696 = vmatprep.subr.bf16.mxu0 %v3695_v5  ;;  %2773 = vmatprep.mubr.f32.mxu0 %v140_v11  ;;  %v3707_v14 = vpack.c.bf16 %v155_v13, %v154_v12  ;;  %v156_v15 = vld [vmem:[#allocation8 + $0x40] sm:$0xff]  ;;  %v158_v18 = vld [vmem:[#allocation8 + $0x50] sm:$0xff]  ;;  %v294_v20 = vld [vmem:[#allocation13 + $0x8] sm:$0xff]  ;;  %p4551_p0 = scmp.ne.s32.totalorder %s2260_s26, %s4550_s28  ;;  %p4556_p2 = scmp.lt.s32.totalorder %s4550_s28, %s4550_s28 }
  0x81   :  { %3698 = vmatpush3.bf16.msra.mxu0 %v3695_v5  ;;  %v3711_v17 = vpack.c.bf16 %v157_v16, %v156_v15  ;;  %v293_v19 = vld [vmem:[#allocation13] sm:$0xff]  ;;  %v159_v21 = vld [vmem:[#allocation8 + $0x58] sm:$0xff]  ;;  %v295_v23 = vld [vmem:[#allocation13 + $0x10] sm:$0xff] }
  0x82   :  { %3700 = vmatprep.subr.bf16.mxu0 %v3699_v7  ;;  %v4784_v22 = vpack.c.bf16 %v294_v20, %v293_v19  ;;  %v296_v24 = vld [vmem:[#allocation13 + $0x18] sm:$0xff]  ;;  %v3715_v26 = vpack.c.bf16 %v159_v21, %v158_v18  ;;  %v297_v27 = vld [vmem:[#allocation13 + $0x20] sm:$0xff]  ;;  %v298_v28 = vld [vmem:[#allocation13 + $0x28] sm:$0xff]  ;;  %p4557_p3 = por %p4556_p2, %p4555_p1 }
  0x83   :  { %v4787_v25 = vpack.c.bf16 %v296_v24, %v295_v23  ;;  %v160_v29 = vld [vmem:[#allocation8 + $0x60] sm:$0xff]  ;;  %v161_v30 = vld [vmem:[#allocation8 + $0x68] sm:$0xff]  ;;  %v4791_v31 = vpack.c.bf16 %v298_v28, %v297_v27  ;;  %v299_v33 = vld [vmem:[#allocation13 + $0x30] sm:$0xff] }
  0x84   :  { %3729 = vmatpush3.bf16.msra.mxu1 %v4784_v22  ;;  %v3719_v32 = vpack.c.bf16 %v161_v30, %v160_v29  ;;  %v300_v34 = vld [vmem:[#allocation13 + $0x38] sm:$0xff]  ;;  %v162_v35 = vld [vmem:[#allocation8 + $0x70] sm:$0xff]  ;;  %v301_v39 = vld [vmem:[#allocation13 + $0x40] sm:$0xff]  ;;  %p4558_p4 = pnand %p4557_p3, %p4551_p0 }
  0x85   :  { %3702 = vmatpush3.bf16.msra.mxu0 %v3699_v7  ;;  %3730 = vmatprep.subr.bf16.mxu1 %v4591_v0  ;;  %v163_v36 = vld [vmem:[#allocation8 + $0x78] sm:$0xff]  ;;  %v4795_v37 = vpack.c.bf16 %v300_v34, %v299_v33  ;;  %v302_v40 = vld [vmem:[#allocation13 + $0x48] sm:$0xff]  ;;  %v379_v42 = vld [vmem:[#allocation10] sm:$0xff] }
  0x86   :  { %3704 = vmatprep.subr.bf16.mxu0 %v3703_v10  ;;  %v3723_v38 = vpack.c.bf16 %v163_v36, %v162_v35  ;;  %v4799_v41 = vpack.c.bf16 %v302_v40, %v301_v39  ;;  %v380_v43 = vld [vmem:[#allocation10 + $0x8] sm:$0xff]  ;;  %v381_v46 = vld [vmem:[#allocation10 + $0x10] sm:$0xff]  ;;  %v382_v47 = vld [vmem:[#allocation10 + $0x18] sm:$0xff] }
  0x87   :  { %v141_v44 = vld [vmem:[#allocation5 + $0x8] sm:$0xff]  ;;  %v4802_v45 = vpack.c.bf16 %v380_v43, %v379_v42  ;;  %v142_v48 = vld [vmem:[#allocation5 + $0x10] sm:$0xff]  ;;  %v4808_v49 = vpack.c.bf16 %v382_v47, %v381_v46  ;;  %v143_v50 = vld [vmem:[#allocation5 + $0x18] sm:$0xff] }
  0x88   :  { %3732 = vmatpush3.bf16.msra.mxu1 %v4787_v25  ;;  %v383_v51 = vld [vmem:[#allocation10 + $0x20] sm:$0xff]  ;;  %v384_v52 = vld [vmem:[#allocation10 + $0x28] sm:$0xff]  ;;  %v385_v56 = vld [vmem:[#allocation10 + $0x30] sm:$0xff] }
  0x89   :  { %3706 = vmatpush3.bf16.msra.mxu0 %v3703_v10  ;;  %3733 = vmatprep.subr.bf16.mxu1 %v4591_v0  ;;  %v144_v53 = vld [vmem:[#allocation5 + $0x20] sm:$0xff]  ;;  %v4812_v54 = vpack.c.bf16 %v384_v52, %v383_v51  ;;  %v145_v55 = vld [vmem:[#allocation5 + $0x28] sm:$0xff]  ;;  %v386_v57 = vld [vmem:[#allocation10 + $0x38] sm:$0xff] }
  0x8a   :  { %3708 = vmatprep.subr.bf16.mxu0 %v3707_v14  ;;  %v146_v58 = vld [vmem:[#allocation5 + $0x30] sm:$0xff]  ;;  %v4816_v59 = vpack.c.bf16 %v386_v57, %v385_v56  ;;  %v147_v60 = vld [vmem:[#allocation5 + $0x38] sm:$0xff]  ;;  %v387_v61 = vld [vmem:[#allocation10 + $0x40] sm:$0xff] }
  0x8b   :  { %v388_v62 = vld [vmem:[#allocation10 + $0x48] sm:$0xff]  ;;  %v389_v2 = vld [vmem:[#allocation10 + $0x50] sm:$0xff]  ;;  %v390_v3 = vld [vmem:[#allocation10 + $0x58] sm:$0xff] }
  0x8c   :  { %3735 = vmatpush3.bf16.msra.mxu1 %v4791_v31  ;;  %v4820_v63 = vpack.c.bf16 %v388_v62, %v387_v61  ;;  %v4826_v4 = vpack.c.bf16 %v390_v3, %v389_v2  ;;  %v391_v5 = vld [vmem:[#allocation10 + $0x60] sm:$0xff]  ;;  %v392_v6 = vld [vmem:[#allocation10 + $0x68] sm:$0xff]  ;;  %v393_v8 = vld [vmem:[#allocation10 + $0x70] sm:$0xff] }
  0x8d   :  { %3710 = vmatpush3.bf16.msra.mxu0 %v3707_v14  ;;  %3736 = vmatprep.subr.bf16.mxu1 %v4591_v0  ;;  %v4830_v7 = vpack.c.bf16 %v392_v6, %v391_v5  ;;  %v394_v9 = vld [vmem:[#allocation10 + $0x78] sm:$0xff]  ;;  %v303_v11 = vld [vmem:[#allocation13 + $0x50] sm:$0xff]  ;;  %v305_v14 = vld [vmem:[#allocation13 + $0x60] sm:$0xff] }
  0x8e   :  { %3712 = vmatprep.subr.bf16.mxu0 %v3711_v17  ;;  %v4834_v10 = vpack.c.bf16 %v394_v9, %v393_v8  ;;  %v304_v12 = vld [vmem:[#allocation13 + $0x58] sm:$0xff]  ;;  %v306_v15 = vld [vmem:[#allocation13 + $0x68] sm:$0xff]  ;;  %v467_v20 = vld [vmem:[#allocation11] sm:$0xff] }
  0x8f   :  { %v4852_v13 = vpack.c.bf16 %v304_v12, %v303_v11  ;;  %v4857_v16 = vpack.c.bf16 %v306_v15, %v305_v14  ;;  %v308_v18 = vld [vmem:[#allocation13 + $0x78] sm:$0xff]  ;;  %v468_v21 = vld [vmem:[#allocation11 + $0x8] sm:$0xff]  ;;  %v469_v24 = vld [vmem:[#allocation11 + $0x10] sm:$0xff] }
  0x90   :  { %3738 = vmatpush3.bf16.msra.mxu1 %v4795_v37  ;;  %v4867_v23 = vpack.c.bf16 %v468_v21, %v467_v20  ;;  %v471_v28 = vld [vmem:[#allocation11 + $0x20] sm:$0xff]  ;;  %v472_v29 = vld [vmem:[#allocation11 + $0x28] sm:$0xff]  ;;  %v474_v33 = vld [vmem:[#allocation11 + $0x38] sm:$0xff] }
  0x91   :  { %3714 = vmatpush3.bf16.msra.mxu0 %v3711_v17  ;;  %3739 = vmatprep.subr.bf16.mxu1 %v4591_v0  ;;  %v307_v17 = vld [vmem:[#allocation13 + $0x70] sm:$0xff]  ;;  %v4880_v30 = vpack.c.bf16 %v472_v29, %v471_v28  ;;  %v475_v35 = vld [vmem:[#allocation11 + $0x40] sm:$0xff]  ;;  %v476_v36 = vld [vmem:[#allocation11 + $0x48] sm:$0xff] }
  0x92   :  { %3716 = vmatprep.subr.bf16.mxu0 %v3715_v26  ;;  %v4861_v19 = vpack.c.bf16 %v308_v18, %v307_v17  ;;  %v477_v39 = vld [vmem:[#allocation11 + $0x50] sm:$0xff]  ;;  %v478_v40 = vld [vmem:[#allocation11 + $0x58] sm:$0xff]  ;;  %v479_v43 = vld [vmem:[#allocation11 + $0x60] sm:$0xff] }
  0x93   :  { %v4893_v42 = vpack.c.bf16 %v478_v40, %v477_v39  ;;  %v481_v46 = vld [vmem:[#allocation11 + $0x70] sm:$0xff]  ;;  %v2271_v51 = vld [vmem:[%s5341_s3] ss:$0 sm:$0xff] }
  0x94   :  { %3741 = vmatpush3.bf16.msra.mxu1 %v4799_v41  ;;  %v4961_v21 = vld [vmem:[%s5344_s6] ss:$0 sm:$0xff] }
  0x95   :  { %3718 = vmatpush3.bf16.msra.mxu0 %v3715_v26  ;;  %3742 = vmatprep.subr.bf16.mxu1 %v4591_v0  ;;  %v470_v26 = vld [vmem:[#allocation11 + $0x18] sm:$0xff] }
  0x96   :  { %3720 = vmatprep.subr.bf16.mxu0 %v3719_v32  ;;  %v4874_v27 = vpack.c.bf16 %v470_v26, %v469_v24 }
  0x98   :  { %3744 = vmatpush3.bf16.msra.mxu1 %v4852_v13 }
  0x99   :  { %3722 = vmatpush3.bf16.msra.mxu0 %v3719_v32  ;;  %3745 = vmatprep.subr.bf16.mxu1 %v4591_v0  ;;  %v473_v32 = vld [vmem:[#allocation11 + $0x30] sm:$0xff] }
  0x9a   :  { %3724 = vmatprep.subr.bf16.mxu0 %v3723_v38  ;;  %v4884_v34 = vpack.c.bf16 %v474_v33, %v473_v32 }
  0x9c   :  { %3747 = vmatpush3.bf16.msra.mxu1 %v4857_v16 }
  0x9d   :  { %3726 = vmatpush3.bf16.msra.mxu0 %v3723_v38  ;;  %3748 = vmatprep.subr.bf16.mxu1 %v4591_v0  ;;  %v4888_v38 = vpack.c.bf16 %v476_v36, %v475_v35 }
  0x9e   :  { %3751 = vmatprep.subr.bf16.mxu0 %v4591_v0 }
  0xa0   :  { %2774 = vmatmul.mubr.f32.vlgmr.msra.gmra.mrb[0].mxu0 %v141_v44  ;;  %3750 = vmatpush3.bf16.msra.mxu1 %v4861_v19  ;;  %v480_v44 = vld [vmem:[#allocation11 + $0x68] sm:$0xff] }
  0xa1   :  { %3753 = vmatpush3.bf16.msra.mxu0 %v4802_v45  ;;  %2776 = vmatprep.mubr.f32.mxu0 %v142_v48  ;;  %v4897_v47 = vpack.c.bf16 %v480_v44, %v479_v43  ;;  %v482_v48 = vld [vmem:[#allocation11 + $0x78] sm:$0xff] }
  0xa2   :  { %3754 = vmatprep.subr.bf16.mxu0 %v4591_v0  ;;  %3775 = vmatprep.subr.bf16.mxu1 %v4591_v0 }
  0xa3   :  { %2818 = vmatmul.mubr.f32.vlgmr.msra.gmra.mrb[0].mxu1 %v4593_v1 }
  0xa4   :  { %2777 = vmatmul.mubr.f32.gmra.mrb[2].mxu0 %v143_v50  ;;  %3777 = vmatpush3.bf16.msra.mxu1 %v4867_v23  ;;  %v4900_v50 = vpack.c.bf16 %v482_v48, %v481_v46 }
  0xa5   :  { %3756 = vmatpush3.bf16.msra.mxu0 %v4808_v49  ;;  %2779 = vmatprep.mubr.f32.mxu0 %v144_v53 }
  0xa6   :  { %3757 = vmatprep.subr.bf16.mxu0 %v4591_v0  ;;  %2887 = vmatprep.mubr.msk.f32.mxu1 %vm4592_vm0, %v4593_v1 }
  0xa7   :  { %3778 = vmatprep.subr.bf16.mxu1 %v4591_v0 }
  0xa8   :  { %2780 = vmatmul.mubr.f32.gmra.mrb[4].mxu0 %v145_v55  ;;  %3780 = vmatpush3.bf16.msra.mxu1 %v4874_v27 }
  0xa9   :  { %3759 = vmatpush3.bf16.msra.mxu0 %v4812_v54  ;;  %2782 = vmatprep.mubr.f32.mxu0 %v146_v58 }
  0xaa   :  { %3760 = vmatprep.subr.bf16.mxu0 %v4591_v0  ;;  %3781 = vmatprep.subr.bf16.mxu1 %v4591_v0 }
  0xac   :  { %2783 = vmatmul.mubr.f32.gmra.mrb[6].mxu0 %v147_v60  ;;  %3783 = vmatpush3.bf16.msra.mxu1 %v4880_v30 }
  0xad   :  { %3762 = vmatpush3.bf16.msra.mxu0 %v4816_v59  ;;  %2852 = vmatprep.mubr.msk.f32.mxu0 %vm4592_vm0, %v4593_v1 }
  0xae   :  { %3763 = vmatprep.subr.bf16.mxu0 %v4591_v0  ;;  %3784 = vmatprep.subr.bf16.mxu1 %v4591_v0 }
  0xb0   :  { %3786 = vmatpush3.bf16.msra.mxu1 %v4884_v34 }
  0xb1   :  { %3765 = vmatpush3.bf16.msra.mxu0 %v4820_v63  ;;  %3787 = vmatprep.subr.bf16.mxu1 %v4591_v0 }
  0xb2   :  { %3766 = vmatprep.subr.bf16.mxu0 %v4591_v0 }
  0xb4   :  { %3789 = vmatpush3.bf16.msra.mxu1 %v4888_v38 }
  0xb5   :  { %3768 = vmatpush3.bf16.msra.mxu0 %v4826_v4  ;;  %3790 = vmatprep.subr.bf16.mxu1 %v4591_v0 }
  0xb6   :  { %3769 = vmatprep.subr.bf16.mxu0 %v4591_v0 }
  0xb8   :  { %3792 = vmatpush3.bf16.msra.mxu1 %v4893_v42 }
  0xb9   :  { %3771 = vmatpush3.bf16.msra.mxu0 %v4830_v7  ;;  %3793 = vmatprep.subr.bf16.mxu1 %v4591_v0 }
  0xba   :  { %3772 = vmatprep.subr.bf16.mxu0 %v4591_v0 }
  0xbc   :  { %3795 = vmatpush3.bf16.msra.mxu1 %v4897_v47 }
  0xbd   :  { %3774 = vmatpush3.bf16.msra.mxu0 %v4834_v10  ;;  %3796 = vmatprep.subr.bf16.mxu1 %v4591_v0 }
  0xbe   :  { %3799 = vmatprep.subr.bf16.mxu0 %v4591_v0 }
  0xc0   :  { %2853 = vmatmul.mubr.f32.vlgmr.msra.gmra.mrb[8].mxu0 %v4593_v1  ;;  %3798 = vmatpush3.bf16.msra.mxu1 %v4900_v50 }
  0xc1   :  { %3801 = vmatpush3.bf16.msra.mxu0 %v4784_v22  ;;  %2922 = vmatprep.mubr.msk.f32.mxu0 %vm4592_vm0, %v4593_v1 }
  0xc2   :  { %3802 = vmatprep.subr.bf16.mxu0 %v4591_v0  ;;  %3823 = vmatprep.subr.bf16.mxu1 %v4591_v0 }
  0xc5   :  { %3804 = vmatpush3.bf16.msra.mxu0 %v4787_v25 }
  0xc6   :  { %3805 = vmatprep.subr.bf16.mxu0 %v4591_v0 }
  0xc9   :  { %3807 = vmatpush3.bf16.msra.mxu0 %v4791_v31 }
  0xca   :  { %3808 = vmatprep.subr.bf16.mxu0 %v4591_v0 }
  0xcd   :  { %3810 = vmatpush3.bf16.msra.mxu0 %v4795_v37 }
  0xce   :  { %3811 = vmatprep.subr.bf16.mxu0 %v4591_v0 }
  0xd1   :  { %3813 = vmatpush3.bf16.msra.mxu0 %v4799_v41 }
  0xd2   :  { %3814 = vmatprep.subr.bf16.mxu0 %v4591_v0 }
  0xd5   :  { %3816 = vmatpush3.bf16.msra.mxu0 %v4852_v13 }
  0xd6   :  { %3817 = vmatprep.subr.bf16.mxu0 %v4591_v0 }
  0xd9   :  { %3819 = vmatpush3.bf16.msra.mxu0 %v4857_v16 }
  0xda   :  { %3820 = vmatprep.subr.bf16.mxu0 %v4591_v0 }
  0xdd   :  { %3822 = vmatpush3.bf16.msra.mxu0 %v4861_v19 }
  0xde   :  { %3847 = vmatprep.subr.bf16.mxu0 %v4591_v0 }
 0x173   :  { %v2775_v52 = vpop.f32.mrb[0].mxu0 }
 0x174   :  { %v4908_v53 = vadd.f32 %v2775_v52, %v2271_v51  ;;  %v237_v55 = vpop.f32.mrb[1].mxu0 }
 0x175   :  { %v238_v11 = vadd.f32 %v2271_v51, %v237_v55 }
 0x176   :  { %v375_v18 = vpop.f32.mrb[0].mxu1 }
 0x177   :  { %v2778_v56 = vpop.f32.mrb[2].mxu0  ;;  %v2819_v20 = vpop.f32.mrb[1].mxu1 }
 0x178   :  { %v4910_v57 = vadd.f32 %v2778_v56, %v2271_v51  ;;  %v247_v58 = vpop.f32.mrb[3].mxu0 }
 0x179   :  { %v4912_v60 = vadd.f32 %v2271_v51, %v247_v58 }
 0x17b   :  { %v2781_v61 = vpop.f32.mrb[4].mxu0 }
 0x17c   :  { %v4914_v62 = vadd.f32 %v2781_v61, %v2271_v51  ;;  %v257_v2 = vpop.f32.mrb[5].mxu0 }
 0x17d   :  { %v4916_v3 = vadd.f32 %v2271_v51, %v257_v2 }
 0x17f   :  { %v2784_v5 = vpop.f32.mrb[6].mxu0 }
 0x180   :  { %v4918_v6 = vadd.f32 %v2784_v5, %v2271_v51  ;;  %v267_v8 = vpop.f32.mrb[7].mxu0 }
 0x181   :  { %v4920_v9 = vadd.f32 %v2271_v51, %v267_v8 }
 0x193   :  { %v462_v12 = vpop.f32.mrb[8].mxu0 }
 0x194   :  { %v463_v14 = vadd.f32 %v462_v12, %v238_v11  ;;  %v2854_v15 = vpop.f32.mrb[9].mxu0 }
 0x196   :  { %4364 = vtanh.f32 %v463_v14 }
 0x1a0   :  { %v4365_v17 = vpop.eup %4364 }
 0x1a1   :  { %2888 = vmatmul.mubr.f32.vlgmr.msra.gmra.mrb[2].mxu1 %v4365_v17 }
 0x1a2   :  { %3825 = vmatpush3.bf16.msra.mxu1 %v4802_v45  ;;  %2957 = vmatprep.mubr.msk.f32.mxu1 %vm4592_vm0, %v4593_v1 }
 0x1a3   :  { %3826 = vmatprep.subr.bf16.mxu1 %v4591_v0 }
 0x1a6   :  { %3828 = vmatpush3.bf16.msra.mxu1 %v4808_v49 }
 0x1a7   :  { %3829 = vmatprep.subr.bf16.mxu1 %v4591_v0 }
 0x1aa   :  { %3831 = vmatpush3.bf16.msra.mxu1 %v4812_v54 }
 0x1ab   :  { %3832 = vmatprep.subr.bf16.mxu1 %v4591_v0 }
 0x1ae   :  { %3834 = vmatpush3.bf16.msra.mxu1 %v4816_v59 }
 0x1af   :  { %3835 = vmatprep.subr.bf16.mxu1 %v4591_v0 }
 0x1b2   :  { %3837 = vmatpush3.bf16.msra.mxu1 %v4820_v63 }
 0x1b3   :  { %3838 = vmatprep.subr.bf16.mxu1 %v4591_v0 }
 0x1b6   :  { %3840 = vmatpush3.bf16.msra.mxu1 %v4826_v4 }
 0x1b7   :  { %3841 = vmatprep.subr.bf16.mxu1 %v4591_v0 }
 0x1ba   :  { %3843 = vmatpush3.bf16.msra.mxu1 %v4830_v7 }
 0x1bb   :  { %3844 = vmatprep.subr.bf16.mxu1 %v4591_v0 }
 0x1be   :  { %3846 = vmatpush3.bf16.msra.mxu1 %v4834_v10 }
 0x1bf   :  { %3871 = vmatprep.subr.bf16.mxu1 %v4591_v0 }
 0x1c1   :  { %2958 = vmatmul.mubr.f32.vlgmr.msra.gmra.mrb[4].mxu1 %v4365_v17 }
 0x1c2   :  { %3873 = vmatpush3.bf16.msra.mxu1 %v4784_v22  ;;  %3027 = vmatprep.mubr.msk.f32.mxu1 %vm4592_vm0, %v4593_v1 }
 0x1c3   :  { %3874 = vmatprep.subr.bf16.mxu1 %v4591_v0 }
 0x1c6   :  { %3876 = vmatpush3.bf16.msra.mxu1 %v4787_v25 }
 0x1c7   :  { %3877 = vmatprep.subr.bf16.mxu1 %v4591_v0 }
 0x1ca   :  { %3879 = vmatpush3.bf16.msra.mxu1 %v4791_v31 }
 0x1cb   :  { %3880 = vmatprep.subr.bf16.mxu1 %v4591_v0 }
 0x1ce   :  { %3882 = vmatpush3.bf16.msra.mxu1 %v4795_v37 }
 0x1cf   :  { %3883 = vmatprep.subr.bf16.mxu1 %v4591_v0 }
 0x1d2   :  { %3885 = vmatpush3.bf16.msra.mxu1 %v4799_v41 }
 0x1d3   :  { %3886 = vmatprep.subr.bf16.mxu1 %v4591_v0 }
 0x1d6   :  { %3888 = vmatpush3.bf16.msra.mxu1 %v4852_v13 }
 0x1d7   :  { %3889 = vmatprep.subr.bf16.mxu1 %v4591_v0 }
 0x1da   :  { %3891 = vmatpush3.bf16.msra.mxu1 %v4857_v16 }
 0x1db   :  { %3892 = vmatprep.subr.bf16.mxu1 %v4591_v0 }
 0x1de   :  { %3894 = vmatpush3.bf16.msra.mxu1 %v4861_v19 }
 0x1df   :  { %3919 = vmatprep.subr.bf16.mxu1 %v4591_v0 }
 0x274   :  { %v549_v24 = vpop.f32.mrb[2].mxu1 }
 0x275   :  { %v550_v26 = vadd.f32 %v549_v24, %v375_v18  ;;  %v2889_v28 = vpop.f32.mrb[3].mxu1 }
 0x277   :  { %v553_v29 = vadd.f32 %v4961_v21, %v550_v26 }
 0x279   :  { %4366 = vtanh.f32 %v553_v29 }
 0x283   :  { %v4367_v32 = vpop.eup %4366 }
 0x284   :  { %2923 = vmatmul.mubr.f32.vlgmr.msra.gmra.mrb[10].mxu0 %v4367_v32 }
 0x285   :  { %3849 = vmatpush3.bf16.msra.mxu0 %v4867_v23  ;;  %2992 = vmatprep.mubr.msk.f32.mxu0 %vm4592_vm0, %v4593_v1 }
 0x286   :  { %3850 = vmatprep.subr.bf16.mxu0 %v4591_v0 }
 0x289   :  { %3852 = vmatpush3.bf16.msra.mxu0 %v4874_v27 }
 0x28a   :  { %3853 = vmatprep.subr.bf16.mxu0 %v4591_v0 }
 0x28d   :  { %3855 = vmatpush3.bf16.msra.mxu0 %v4880_v30 }
 0x28e   :  { %3856 = vmatprep.subr.bf16.mxu0 %v4591_v0 }
 0x291   :  { %3858 = vmatpush3.bf16.msra.mxu0 %v4884_v34 }
 0x292   :  { %3859 = vmatprep.subr.bf16.mxu0 %v4591_v0 }
 0x294   :  { %v693_v33 = vpop.f32.mrb[4].mxu1 }
 0x295   :  { %v694_v35 = vadd.f32 %v693_v33, %v4908_v53  ;;  %v2959_v36 = vpop.f32.mrb[5].mxu1  ;;  %3861 = vmatpush3.bf16.msra.mxu0 %v4888_v38 }
 0x296   :  { %3862 = vmatprep.subr.bf16.mxu0 %v4591_v0 }
 0x297   :  { %4368 = vtanh.f32 %v694_v35 }
 0x299   :  { %3864 = vmatpush3.bf16.msra.mxu0 %v4893_v42 }
 0x29a   :  { %3865 = vmatprep.subr.bf16.mxu0 %v4591_v0 }
 0x29d   :  { %3867 = vmatpush3.bf16.msra.mxu0 %v4897_v47 }
 0x29e   :  { %3868 = vmatprep.subr.bf16.mxu0 %v4591_v0 }
 0x2a1   :  { %3870 = vmatpush3.bf16.msra.mxu0 %v4900_v50  ;;  %v4369_v39 = vpop.eup %4368 }
 0x2a2   :  { %3895 = vmatprep.subr.bf16.mxu0 %v4591_v0 }
 0x2a4   :  { %2993 = vmatmul.mubr.f32.vlgmr.msra.gmra.mrb[12].mxu0 %v4369_v39 }
 0x2a5   :  { %3897 = vmatpush3.bf16.msra.mxu0 %v4802_v45  ;;  %3062 = vmatprep.mubr.msk.f32.mxu0 %vm4592_vm0, %v4593_v1 }
 0x2a6   :  { %3898 = vmatprep.subr.bf16.mxu0 %v4591_v0 }
 0x2a9   :  { %3900 = vmatpush3.bf16.msra.mxu0 %v4808_v49 }
 0x2aa   :  { %3901 = vmatprep.subr.bf16.mxu0 %v4591_v0 }
 0x2ad   :  { %3903 = vmatpush3.bf16.msra.mxu0 %v4812_v54 }
 0x2ae   :  { %3904 = vmatprep.subr.bf16.mxu0 %v4591_v0 }
 0x2b1   :  { %3906 = vmatpush3.bf16.msra.mxu0 %v4816_v59 }
 0x2b2   :  { %3907 = vmatprep.subr.bf16.mxu0 %v4591_v0 }
 0x2b5   :  { %3909 = vmatpush3.bf16.msra.mxu0 %v4820_v63 }
 0x2b6   :  { %3910 = vmatprep.subr.bf16.mxu0 %v4591_v0 }
 0x2b9   :  { %3912 = vmatpush3.bf16.msra.mxu0 %v4826_v4 }
 0x2ba   :  { %3913 = vmatprep.subr.bf16.mxu0 %v4591_v0 }
 0x2bd   :  { %3915 = vmatpush3.bf16.msra.mxu0 %v4830_v7 }
 0x2be   :  { %3916 = vmatprep.subr.bf16.mxu0 %v4591_v0 }
 0x2c1   :  { %3918 = vmatpush3.bf16.msra.mxu0 %v4834_v10 }
 0x2c2   :  { %3943 = vmatprep.subr.bf16.mxu0 %v4591_v0 }
 0x2c4   :  { %3063 = vmatmul.mubr.f32.vlgmr.msra.gmra.mrb[14].mxu0 %v4369_v39 }
 0x2c5   :  { %3945 = vmatpush3.bf16.msra.mxu0 %v4784_v22  ;;  %3132 = vmatprep.mubr.msk.f32.mxu0 %vm4592_vm0, %v4593_v1 }
 0x2c6   :  { %3946 = vmatprep.subr.bf16.mxu0 %v4591_v0 }
 0x2c9   :  { %3948 = vmatpush3.bf16.msra.mxu0 %v4787_v25 }
 0x2ca   :  { %3949 = vmatprep.subr.bf16.mxu0 %v4591_v0 }
 0x2cd   :  { %3951 = vmatpush3.bf16.msra.mxu0 %v4791_v31 }
 0x2ce   :  { %3952 = vmatprep.subr.bf16.mxu0 %v4591_v0 }
 0x2d1   :  { %3954 = vmatpush3.bf16.msra.mxu0 %v4795_v37 }
 0x2d2   :  { %3955 = vmatprep.subr.bf16.mxu0 %v4591_v0 }
 0x2d5   :  { %3957 = vmatpush3.bf16.msra.mxu0 %v4799_v41 }
 0x2d6   :  { %3958 = vmatprep.subr.bf16.mxu0 %v4591_v0 }
 0x2d9   :  { %3960 = vmatpush3.bf16.msra.mxu0 %v4852_v13 }
 0x2da   :  { %3961 = vmatprep.subr.bf16.mxu0 %v4591_v0 }
 0x2dd   :  { %3963 = vmatpush3.bf16.msra.mxu0 %v4857_v16 }
 0x2de   :  { %3964 = vmatprep.subr.bf16.mxu0 %v4591_v0 }
 0x2e1   :  { %3966 = vmatpush3.bf16.msra.mxu0 %v4861_v19 }
 0x2e2   :  { %3991 = vmatprep.subr.bf16.mxu0 %v4591_v0 }
 0x357   :  { %v621_v40 = vpop.f32.mrb[10].mxu0 }
 0x358   :  { %v2924_v43 = vpop.f32.mrb[11].mxu0 }
 0x377   :  { %v764_v44 = vpop.f32.mrb[12].mxu0 }
 0x378   :  { %v765_v46 = vadd.f32 %v764_v44, %v621_v40  ;;  %v2994_v48 = vpop.f32.mrb[13].mxu0 }
 0x37a   :  { %v768_v51 = vadd.f32 %v4961_v21, %v765_v46 }
 0x37c   :  { %4370 = vtanh.f32 %v768_v51 }
 0x386   :  { %v4371_v52 = vpop.eup %4370 }
 0x387   :  { %3028 = vmatmul.mubr.f32.vlgmr.msra.gmra.mrb[6].mxu1 %v4371_v52 }
 0x388   :  { %3921 = vmatpush3.bf16.msra.mxu1 %v4867_v23  ;;  %3097 = vmatprep.mubr.msk.f32.mxu1 %vm4592_vm0, %v4593_v1 }
 0x389   :  { %3922 = vmatprep.subr.bf16.mxu1 %v4591_v0 }
 0x38c   :  { %3924 = vmatpush3.bf16.msra.mxu1 %v4874_v27 }
 0x38d   :  { %3925 = vmatprep.subr.bf16.mxu1 %v4591_v0 }
 0x390   :  { %3927 = vmatpush3.bf16.msra.mxu1 %v4880_v30 }
 0x391   :  { %3928 = vmatprep.subr.bf16.mxu1 %v4591_v0 }
 0x394   :  { %3930 = vmatpush3.bf16.msra.mxu1 %v4884_v34 }
 0x395   :  { %3931 = vmatprep.subr.bf16.mxu1 %v4591_v0 }
 0x397   :  { %v908_v53 = vpop.f32.mrb[14].mxu0 }
 0x398   :  { %v909_v55 = vadd.f32 %v908_v53, %v4912_v60  ;;  %3933 = vmatpush3.bf16.msra.mxu1 %v4888_v38  ;;  %v3064_v56 = vpop.f32.mrb[15].mxu0 }
 0x399   :  { %3934 = vmatprep.subr.bf16.mxu1 %v4591_v0 }
 0x39a   :  { %4372 = vtanh.f32 %v909_v55 }
 0x39c   :  { %3936 = vmatpush3.bf16.msra.mxu1 %v4893_v42 }
 0x39d   :  { %3937 = vmatprep.subr.bf16.mxu1 %v4591_v0 }
 0x3a0   :  { %3939 = vmatpush3.bf16.msra.mxu1 %v4897_v47 }
 0x3a1   :  { %3940 = vmatprep.subr.bf16.mxu1 %v4591_v0 }
 0x3a4   :  { %v4373_v58 = vpop.eup %4372  ;;  %3942 = vmatpush3.bf16.msra.mxu1 %v4900_v50 }
 0x3a5   :  { %3967 = vmatprep.subr.bf16.mxu1 %v4591_v0 }
 0x3a7   :  { %3098 = vmatmul.mubr.f32.vlgmr.msra.gmra.mrb[8].mxu1 %v4373_v58 }
 0x3a8   :  { %3969 = vmatpush3.bf16.msra.mxu1 %v4802_v45  ;;  %3167 = vmatprep.mubr.msk.f32.mxu1 %vm4592_vm0, %v4593_v1 }
 0x3a9   :  { %3970 = vmatprep.subr.bf16.mxu1 %v4591_v0 }
 0x3ac   :  { %3972 = vmatpush3.bf16.msra.mxu1 %v4808_v49 }
 0x3ad   :  { %3973 = vmatprep.subr.bf16.mxu1 %v4591_v0 }
 0x3b0   :  { %3975 = vmatpush3.bf16.msra.mxu1 %v4812_v54 }
 0x3b1   :  { %3976 = vmatprep.subr.bf16.mxu1 %v4591_v0 }
 0x3b4   :  { %3978 = vmatpush3.bf16.msra.mxu1 %v4816_v59 }
 0x3b5   :  { %3979 = vmatprep.subr.bf16.mxu1 %v4591_v0 }
 0x3b8   :  { %3981 = vmatpush3.bf16.msra.mxu1 %v4820_v63 }
 0x3b9   :  { %3982 = vmatprep.subr.bf16.mxu1 %v4591_v0 }
 0x3bc   :  { %3984 = vmatpush3.bf16.msra.mxu1 %v4826_v4 }
 0x3bd   :  { %3985 = vmatprep.subr.bf16.mxu1 %v4591_v0 }
 0x3c0   :  { %3987 = vmatpush3.bf16.msra.mxu1 %v4830_v7 }
 0x3c1   :  { %3988 = vmatprep.subr.bf16.mxu1 %v4591_v0 }
 0x3c4   :  { %3990 = vmatpush3.bf16.msra.mxu1 %v4834_v10 }
 0x3c5   :  { %4015 = vmatprep.subr.bf16.mxu1 %v4591_v0 }
 0x3c7   :  { %3168 = vmatmul.mubr.f32.vlgmr.msra.gmra.mrb[10].mxu1 %v4373_v58 }
 0x3c8   :  { %4017 = vmatpush3.bf16.msra.mxu1 %v4784_v22  ;;  %3237 = vmatprep.mubr.msk.f32.mxu1 %vm4592_vm0, %v4593_v1 }
 0x3c9   :  { %4018 = vmatprep.subr.bf16.mxu1 %v4591_v0 }
 0x3cc   :  { %4020 = vmatpush3.bf16.msra.mxu1 %v4787_v25 }
 0x3cd   :  { %4021 = vmatprep.subr.bf16.mxu1 %v4591_v0 }
 0x3d0   :  { %4023 = vmatpush3.bf16.msra.mxu1 %v4791_v31 }
 0x3d1   :  { %4024 = vmatprep.subr.bf16.mxu1 %v4591_v0 }
 0x3d4   :  { %4026 = vmatpush3.bf16.msra.mxu1 %v4795_v37 }
 0x3d5   :  { %4027 = vmatprep.subr.bf16.mxu1 %v4591_v0 }
 0x3d8   :  { %4029 = vmatpush3.bf16.msra.mxu1 %v4799_v41 }
 0x3d9   :  { %4030 = vmatprep.subr.bf16.mxu1 %v4591_v0 }
 0x3dc   :  { %4032 = vmatpush3.bf16.msra.mxu1 %v4852_v13 }
 0x3dd   :  { %4033 = vmatprep.subr.bf16.mxu1 %v4591_v0 }
 0x3e0   :  { %4035 = vmatpush3.bf16.msra.mxu1 %v4857_v16 }
 0x3e1   :  { %4036 = vmatprep.subr.bf16.mxu1 %v4591_v0 }
 0x3e4   :  { %4038 = vmatpush3.bf16.msra.mxu1 %v4861_v19 }
 0x3e5   :  { %4063 = vmatprep.subr.bf16.mxu1 %v4591_v0 }
 0x45a   :  { %v836_v60 = vpop.f32.mrb[6].mxu1 }
 0x45b   :  { %v3029_v61 = vpop.f32.mrb[7].mxu1 }
 0x47a   :  { %v979_v2 = vpop.f32.mrb[8].mxu1 }
 0x47b   :  { %v980_v5 = vadd.f32 %v979_v2, %v836_v60  ;;  %v3099_v8 = vpop.f32.mrb[9].mxu1  ;;  %v2070_v2 = vld [vmem:[#allocation14 + $0x28] sm:$0xff] }
 0x47c   :  { %v2072_v8 = vld [vmem:[#allocation14 + $0x38] sm:$0xff] }
 0x47d   :  { %v983_v11 = vadd.f32 %v4961_v21, %v980_v5 }
 0x47f   :  { %4374 = vtanh.f32 %v983_v11 }
 0x489   :  { %v4375_v12 = vpop.eup %4374 }
 0x48a   :  { %3133 = vmatmul.mubr.f32.vlgmr.msra.gmra.mrb[16].mxu0 %v4375_v12  ;;  %v2074_v12 = vld [vmem:[#allocation14 + $0x48] sm:$0xff] }
 0x48b   :  { %3993 = vmatpush3.bf16.msra.mxu0 %v4867_v23  ;;  %3202 = vmatprep.mubr.msk.f32.mxu0 %vm4592_vm0, %v4593_v1 }
 0x48c   :  { %3994 = vmatprep.subr.bf16.mxu0 %v4591_v0 }
 0x48f   :  { %3996 = vmatpush3.bf16.msra.mxu0 %v4874_v27 }
 0x490   :  { %3997 = vmatprep.subr.bf16.mxu0 %v4591_v0 }
 0x493   :  { %3999 = vmatpush3.bf16.msra.mxu0 %v4880_v30 }
 0x494   :  { %4000 = vmatprep.subr.bf16.mxu0 %v4591_v0 }
 0x497   :  { %4002 = vmatpush3.bf16.msra.mxu0 %v4884_v34 }
 0x498   :  { %4003 = vmatprep.subr.bf16.mxu0 %v4591_v0 }
 0x49a   :  { %v1123_v14 = vpop.f32.mrb[10].mxu1 }
 0x49b   :  { %v1124_v15 = vadd.f32 %v1123_v14, %v4910_v57  ;;  %4005 = vmatpush3.bf16.msra.mxu0 %v4888_v38  ;;  %v3169_v17 = vpop.f32.mrb[11].mxu1 }
 0x49c   :  { %4006 = vmatprep.subr.bf16.mxu0 %v4591_v0  ;;  %v2076_v17 = vld [vmem:[#allocation14 + $0x58] sm:$0xff] }
 0x49d   :  { %4376 = vtanh.f32 %v1124_v15  ;;  %v2075_v15 = vld [vmem:[#allocation14 + $0x50] sm:$0xff] }
 0x49f   :  { %4008 = vmatpush3.bf16.msra.mxu0 %v4893_v42 }
 0x4a0   :  { %4009 = vmatprep.subr.bf16.mxu0 %v4591_v0 }
 0x4a3   :  { %4011 = vmatpush3.bf16.msra.mxu0 %v4897_v47 }
 0x4a4   :  { %4012 = vmatprep.subr.bf16.mxu0 %v4591_v0 }
 0x4a7   :  { %v4377_v18 = vpop.eup %4376  ;;  %4014 = vmatpush3.bf16.msra.mxu0 %v4900_v50 }
 0x4a8   :  { %4039 = vmatprep.subr.bf16.mxu0 %v4591_v0 }
 0x4aa   :  { %3203 = vmatmul.mubr.f32.vlgmr.msra.gmra.mrb[18].mxu0 %v4377_v18 }
 0x4ab   :  { %4041 = vmatpush3.bf16.msra.mxu0 %v4802_v45  ;;  %3272 = vmatprep.mubr.msk.f32.mxu0 %vm4592_vm0, %v4593_v1 }
 0x4ac   :  { %4042 = vmatprep.subr.bf16.mxu0 %v4591_v0 }
 0x4af   :  { %4044 = vmatpush3.bf16.msra.mxu0 %v4808_v49 }
 0x4b0   :  { %4045 = vmatprep.subr.bf16.mxu0 %v4591_v0 }
 0x4b3   :  { %4047 = vmatpush3.bf16.msra.mxu0 %v4812_v54 }
 0x4b4   :  { %4048 = vmatprep.subr.bf16.mxu0 %v4591_v0 }
 0x4b7   :  { %4050 = vmatpush3.bf16.msra.mxu0 %v4816_v59 }
 0x4b8   :  { %4051 = vmatprep.subr.bf16.mxu0 %v4591_v0 }
 0x4bb   :  { %4053 = vmatpush3.bf16.msra.mxu0 %v4820_v63 }
 0x4bc   :  { %4054 = vmatprep.subr.bf16.mxu0 %v4591_v0 }
 0x4bf   :  { %4056 = vmatpush3.bf16.msra.mxu0 %v4826_v4 }
 0x4c0   :  { %4057 = vmatprep.subr.bf16.mxu0 %v4591_v0 }
 0x4c3   :  { %4059 = vmatpush3.bf16.msra.mxu0 %v4830_v7 }
 0x4c4   :  { %4060 = vmatprep.subr.bf16.mxu0 %v4591_v0 }
 0x4c7   :  { %4062 = vmatpush3.bf16.msra.mxu0 %v4834_v10 }
 0x4c8   :  { %4087 = vmatprep.subr.bf16.mxu0 %v4591_v0 }
 0x4ca   :  { %3273 = vmatmul.mubr.f32.vlgmr.msra.gmra.mrb[20].mxu0 %v4377_v18  ;;  %v4319_v18 = vpack.c.bf16 %v2076_v17, %v2075_v15 }
 0x4cb   :  { %4089 = vmatpush3.bf16.msra.mxu0 %v4784_v22  ;;  %3342 = vmatprep.mubr.msk.f32.mxu0 %vm4592_vm0, %v4593_v1 }
 0x4cc   :  { %4090 = vmatprep.subr.bf16.mxu0 %v4591_v0 }
 0x4cf   :  { %4092 = vmatpush3.bf16.msra.mxu0 %v4787_v25 }
 0x4d0   :  { %4093 = vmatprep.subr.bf16.mxu0 %v4591_v0 }
 0x4d3   :  { %4095 = vmatpush3.bf16.msra.mxu0 %v4791_v31 }
 0x4d4   :  { %4096 = vmatprep.subr.bf16.mxu0 %v4591_v0 }
 0x4d7   :  { %4098 = vmatpush3.bf16.msra.mxu0 %v4795_v37 }
 0x4d8   :  { %4099 = vmatprep.subr.bf16.mxu0 %v4591_v0 }
 0x4db   :  { %4101 = vmatpush3.bf16.msra.mxu0 %v4799_v41 }
 0x4dc   :  { %4102 = vmatprep.subr.bf16.mxu0 %v4591_v0 }
 0x4df   :  { %4104 = vmatpush3.bf16.msra.mxu0 %v4852_v13 }
 0x4e0   :  { %4105 = vmatprep.subr.bf16.mxu0 %v4591_v0 }
 0x4e3   :  { %4107 = vmatpush3.bf16.msra.mxu0 %v4857_v16 }
 0x4e4   :  { %4108 = vmatprep.subr.bf16.mxu0 %v4591_v0 }
 0x4e7   :  { %4110 = vmatpush3.bf16.msra.mxu0 %v4861_v19 }
 0x4e8   :  { %4135 = vmatprep.subr.bf16.mxu0 %v4591_v0 }
 0x55d   :  { %v1051_v57 = vpop.f32.mrb[16].mxu0 }
 0x55e   :  { %v3134_v20 = vpop.f32.mrb[17].mxu0 }
 0x55f   :  { %v2078_v20 = vld [vmem:[#allocation14 + $0x68] sm:$0xff] }
 0x57d   :  { %v1194_v24 = vpop.f32.mrb[18].mxu0 }
 0x57e   :  { %v1195_v26 = vadd.f32 %v1194_v24, %v1051_v57  ;;  %v3204_v28 = vpop.f32.mrb[19].mxu0  ;;  %v2077_v57 = vld [vmem:[#allocation14 + $0x60] sm:$0xff] }
 0x57f   :  { %v4322_v24 = vpack.c.bf16 %v2078_v20, %v2077_v57  ;;  %v2080_v28 = vld [vmem:[#allocation14 + $0x78] sm:$0xff] }
 0x580   :  { %v1198_v29 = vadd.f32 %v4961_v21, %v1195_v26  ;;  %v2079_v26 = vld [vmem:[#allocation14 + $0x70] sm:$0xff] }
 0x582   :  { %4378 = vtanh.f32 %v1198_v29  ;;  %v4325_v29 = vpack.c.bf16 %v2080_v28, %v2079_v26 }
 0x58c   :  { %v4379_v32 = vpop.eup %4378 }
 0x58d   :  { %3238 = vmatmul.mubr.f32.vlgmr.msra.gmra.mrb[12].mxu1 %v4379_v32  ;;  %v2159_v32 = vld [vmem:[#allocation16] sm:$0xff] }
 0x58e   :  { %4065 = vmatpush3.bf16.msra.mxu1 %v4867_v23  ;;  %3307 = vmatprep.mubr.msk.f32.mxu1 %vm4592_vm0, %v4593_v1 }
 0x58f   :  { %4066 = vmatprep.subr.bf16.mxu1 %v4591_v0 }
 0x592   :  { %4068 = vmatpush3.bf16.msra.mxu1 %v4874_v27 }
 0x593   :  { %4069 = vmatprep.subr.bf16.mxu1 %v4591_v0 }
 0x596   :  { %4071 = vmatpush3.bf16.msra.mxu1 %v4880_v30 }
 0x597   :  { %4072 = vmatprep.subr.bf16.mxu1 %v4591_v0 }
 0x59a   :  { %4074 = vmatpush3.bf16.msra.mxu1 %v4884_v34 }
 0x59b   :  { %4075 = vmatprep.subr.bf16.mxu1 %v4591_v0 }
 0x59d   :  { %v1338_v33 = vpop.f32.mrb[20].mxu0 }
 0x59e   :  { %v1339_v35 = vadd.f32 %v1338_v33, %v4916_v3  ;;  %4077 = vmatpush3.bf16.msra.mxu1 %v4888_v38  ;;  %v3274_v36 = vpop.f32.mrb[21].mxu0  ;;  %v2160_v33 = vld [vmem:[#allocation16 + $0x8] sm:$0xff] }
 0x59f   :  { %4078 = vmatprep.subr.bf16.mxu1 %v4591_v0  ;;  %v4328_v36 = vpack.c.bf16 %v2160_v33, %v2159_v32 }
 0x5a0   :  { %4380 = vtanh.f32 %v1339_v35  ;;  %v2161_v35 = vld [vmem:[#allocation16 + $0x10] sm:$0xff] }
 0x5a2   :  { %4080 = vmatpush3.bf16.msra.mxu1 %v4893_v42 }
 0x5a3   :  { %4081 = vmatprep.subr.bf16.mxu1 %v4591_v0 }
 0x5a6   :  { %4083 = vmatpush3.bf16.msra.mxu1 %v4897_v47 }
 0x5a7   :  { %4084 = vmatprep.subr.bf16.mxu1 %v4591_v0 }
 0x5aa   :  { %v4381_v39 = vpop.eup %4380  ;;  %4086 = vmatpush3.bf16.msra.mxu1 %v4900_v50 }
 0x5ab   :  { %4111 = vmatprep.subr.bf16.mxu1 %v4591_v0 }
 0x5ad   :  { %3308 = vmatmul.mubr.f32.vlgmr.msra.gmra.mrb[14].mxu1 %v4381_v39 }
 0x5ae   :  { %4113 = vmatpush3.bf16.msra.mxu1 %v4802_v45  ;;  %3377 = vmatprep.mubr.msk.f32.mxu1 %vm4592_vm0, %v4593_v1 }
 0x5af   :  { %4114 = vmatprep.subr.bf16.mxu1 %v4591_v0 }
 0x5b2   :  { %4116 = vmatpush3.bf16.msra.mxu1 %v4808_v49 }
 0x5b3   :  { %4117 = vmatprep.subr.bf16.mxu1 %v4591_v0 }
 0x5b6   :  { %4119 = vmatpush3.bf16.msra.mxu1 %v4812_v54 }
 0x5b7   :  { %4120 = vmatprep.subr.bf16.mxu1 %v4591_v0 }
 0x5ba   :  { %4122 = vmatpush3.bf16.msra.mxu1 %v4816_v59 }
 0x5bb   :  { %4123 = vmatprep.subr.bf16.mxu1 %v4591_v0 }
 0x5be   :  { %4125 = vmatpush3.bf16.msra.mxu1 %v4820_v63 }
 0x5bf   :  { %4126 = vmatprep.subr.bf16.mxu1 %v4591_v0 }
 0x5c2   :  { %4128 = vmatpush3.bf16.msra.mxu1 %v4826_v4 }
 0x5c3   :  { %4129 = vmatprep.subr.bf16.mxu1 %v4591_v0 }
 0x5c6   :  { %4131 = vmatpush3.bf16.msra.mxu1 %v4830_v7 }
 0x5c7   :  { %4132 = vmatprep.subr.bf16.mxu1 %v4591_v0 }
 0x5ca   :  { %4134 = vmatpush3.bf16.msra.mxu1 %v4834_v10 }
 0x5cb   :  { %4159 = vmatprep.subr.bf16.mxu1 %v4591_v0 }
 0x5cd   :  { %3378 = vmatmul.mubr.f32.vlgmr.msra.gmra.mrb[16].mxu1 %v4381_v39  ;;  %v2162_v39 = vld [vmem:[#allocation16 + $0x18] sm:$0xff] }
 0x5ce   :  { %4161 = vmatpush3.bf16.msra.mxu1 %v4784_v22  ;;  %3447 = vmatprep.mubr.msk.f32.mxu1 %vm4592_vm0, %v4593_v1 }
 0x5cf   :  { %4162 = vmatprep.subr.bf16.mxu1 %v4591_v0 }
 0x5d2   :  { %4164 = vmatpush3.bf16.msra.mxu1 %v4787_v25 }
 0x5d3   :  { %4165 = vmatprep.subr.bf16.mxu1 %v4591_v0 }
 0x5d6   :  { %4167 = vmatpush3.bf16.msra.mxu1 %v4791_v31 }
 0x5d7   :  { %4168 = vmatprep.subr.bf16.mxu1 %v4591_v0 }
 0x5da   :  { %4170 = vmatpush3.bf16.msra.mxu1 %v4795_v37 }
 0x5db   :  { %4171 = vmatprep.subr.bf16.mxu1 %v4591_v0 }
 0x5de   :  { %4173 = vmatpush3.bf16.msra.mxu1 %v4799_v41 }
 0x5df   :  { %4174 = vmatprep.subr.bf16.mxu1 %v4591_v0 }
 0x5e2   :  { %4176 = vmatpush3.bf16.msra.mxu1 %v4852_v13 }
 0x5e3   :  { %4177 = vmatprep.subr.bf16.mxu1 %v4591_v0 }
 0x5e6   :  { %4179 = vmatpush3.bf16.msra.mxu1 %v4857_v16 }
 0x5e7   :  { %4180 = vmatprep.subr.bf16.mxu1 %v4591_v0 }
 0x5ea   :  { %4182 = vmatpush3.bf16.msra.mxu1 %v4861_v19 }
 0x5eb   :  { %4207 = vmatprep.subr.bf16.mxu1 %v4591_v0 }
 0x660   :  { %v1266_v3 = vpop.f32.mrb[12].mxu1 }
 0x661   :  { %v3239_v40 = vpop.f32.mrb[13].mxu1 }
 0x662   :  { %v2163_v40 = vld [vmem:[#allocation16 + $0x20] sm:$0xff] }
 0x680   :  { %v1409_v43 = vpop.f32.mrb[14].mxu1 }
 0x681   :  { %v1410_v44 = vadd.f32 %v1409_v43, %v1266_v3  ;;  %v3309_v46 = vpop.f32.mrb[15].mxu1  ;;  %v4331_v3 = vpack.c.bf16 %v2162_v39, %v2161_v35  ;;  %v2164_v43 = vld [vmem:[#allocation16 + $0x28] sm:$0xff] }
 0x682   :  { %v2165_v46 = vld [vmem:[#allocation16 + $0x30] sm:$0xff] }
 0x683   :  { %v1413_v48 = vadd.f32 %v4961_v21, %v1410_v44  ;;  %v4334_v44 = vpack.c.bf16 %v2164_v43, %v2163_v40 }
 0x685   :  { %4382 = vtanh.f32 %v1413_v48  ;;  %v2166_v48 = vld [vmem:[#allocation16 + $0x38] sm:$0xff] }
 0x68f   :  { %v4383_v51 = vpop.eup %4382 }
 0x690   :  { %3343 = vmatmul.mubr.f32.vlgmr.msra.gmra.mrb[22].mxu0 %v4383_v51  ;;  %v4337_v51 = vpack.c.bf16 %v2166_v48, %v2165_v46 }
 0x691   :  { %4137 = vmatpush3.bf16.msra.mxu0 %v4867_v23  ;;  %3412 = vmatprep.mubr.msk.f32.mxu0 %vm4592_vm0, %v4593_v1 }
 0x692   :  { %4138 = vmatprep.subr.bf16.mxu0 %v4591_v0 }
 0x695   :  { %4140 = vmatpush3.bf16.msra.mxu0 %v4874_v27 }
 0x696   :  { %4141 = vmatprep.subr.bf16.mxu0 %v4591_v0 }
 0x699   :  { %4143 = vmatpush3.bf16.msra.mxu0 %v4880_v30 }
 0x69a   :  { %4144 = vmatprep.subr.bf16.mxu0 %v4591_v0 }
 0x69d   :  { %4146 = vmatpush3.bf16.msra.mxu0 %v4884_v34 }
 0x69e   :  { %4147 = vmatprep.subr.bf16.mxu0 %v4591_v0 }
 0x6a0   :  { %v1553_v52 = vpop.f32.mrb[16].mxu1 }
 0x6a1   :  { %v1554_v53 = vadd.f32 %v1553_v52, %v4914_v62  ;;  %4149 = vmatpush3.bf16.msra.mxu0 %v4888_v38  ;;  %v3379_v55 = vpop.f32.mrb[17].mxu1  ;;  %v2167_v52 = vld [vmem:[#allocation16 + $0x40] sm:$0xff] }
 0x6a2   :  { %4150 = vmatprep.subr.bf16.mxu0 %v4591_v0 }
 0x6a3   :  { %4384 = vtanh.f32 %v1554_v53  ;;  %v2168_v53 = vld [vmem:[#allocation16 + $0x48] sm:$0xff] }
 0x6a4   :  { %v4340_v55 = vpack.c.bf16 %v2168_v53, %v2167_v52 }
 0x6a5   :  { %4152 = vmatpush3.bf16.msra.mxu0 %v4893_v42 }
 0x6a6   :  { %4153 = vmatprep.subr.bf16.mxu0 %v4591_v0 }
 0x6a9   :  { %4155 = vmatpush3.bf16.msra.mxu0 %v4897_v47 }
 0x6aa   :  { %4156 = vmatprep.subr.bf16.mxu0 %v4591_v0 }
 0x6ad   :  { %v4385_v56 = vpop.eup %4384  ;;  %4158 = vmatpush3.bf16.msra.mxu0 %v4900_v50 }
 0x6ae   :  { %4183 = vmatprep.subr.bf16.mxu0 %v4591_v0 }
 0x6b0   :  { %3413 = vmatmul.mubr.f32.vlgmr.msra.gmra.mrb[24].mxu0 %v4385_v56 }
 0x6b1   :  { %4185 = vmatpush3.bf16.msra.mxu0 %v4802_v45  ;;  %3482 = vmatprep.mubr.msk.f32.mxu0 %vm4592_vm0, %v4593_v1 }
 0x6b2   :  { %4186 = vmatprep.subr.bf16.mxu0 %v4591_v0 }
 0x6b5   :  { %4188 = vmatpush3.bf16.msra.mxu0 %v4808_v49 }
 0x6b6   :  { %4189 = vmatprep.subr.bf16.mxu0 %v4591_v0 }
 0x6b9   :  { %4191 = vmatpush3.bf16.msra.mxu0 %v4812_v54 }
 0x6ba   :  { %4192 = vmatprep.subr.bf16.mxu0 %v4591_v0 }
 0x6bd   :  { %4194 = vmatpush3.bf16.msra.mxu0 %v4816_v59 }
 0x6be   :  { %4195 = vmatprep.subr.bf16.mxu0 %v4591_v0 }
 0x6c1   :  { %4197 = vmatpush3.bf16.msra.mxu0 %v4820_v63 }
 0x6c2   :  { %4198 = vmatprep.subr.bf16.mxu0 %v4591_v0 }
 0x6c5   :  { %4200 = vmatpush3.bf16.msra.mxu0 %v4826_v4 }
 0x6c6   :  { %4201 = vmatprep.subr.bf16.mxu0 %v4591_v0 }
 0x6c9   :  { %4203 = vmatpush3.bf16.msra.mxu0 %v4830_v7 }
 0x6ca   :  { %4204 = vmatprep.subr.bf16.mxu0 %v4591_v0 }
 0x6cd   :  { %4206 = vmatpush3.bf16.msra.mxu0 %v4834_v10 }
 0x6ce   :  { %4231 = vmatprep.subr.bf16.mxu0 %v4591_v0 }
 0x6d0   :  { %3483 = vmatmul.mubr.f32.vlgmr.msra.gmra.mrb[26].mxu0 %v4385_v56  ;;  %v2169_v56 = vld [vmem:[#allocation16 + $0x50] sm:$0xff] }
 0x6d1   :  { %4233 = vmatpush3.bf16.msra.mxu0 %v4784_v22  ;;  %3552 = vmatprep.mubr.msk.f32.mxu0 %vm4592_vm0, %v4593_v1 }
 0x6d2   :  { %4234 = vmatprep.subr.bf16.mxu0 %v4591_v0 }
 0x6d5   :  { %4236 = vmatpush3.bf16.msra.mxu0 %v4787_v25 }
 0x6d6   :  { %4237 = vmatprep.subr.bf16.mxu0 %v4591_v0 }
 0x6d9   :  { %4239 = vmatpush3.bf16.msra.mxu0 %v4791_v31 }
 0x6da   :  { %4240 = vmatprep.subr.bf16.mxu0 %v4591_v0 }
 0x6dd   :  { %4242 = vmatpush3.bf16.msra.mxu0 %v4795_v37 }
 0x6de   :  { %4243 = vmatprep.subr.bf16.mxu0 %v4591_v0 }
 0x6e1   :  { %4245 = vmatpush3.bf16.msra.mxu0 %v4799_v41 }
 0x6e2   :  { %4246 = vmatprep.subr.bf16.mxu0 %v4591_v0 }
 0x6e5   :  { %4248 = vmatpush3.bf16.msra.mxu0 %v4852_v13 }
 0x6e6   :  { %4249 = vmatprep.subr.bf16.mxu0 %v4591_v0 }
 0x6e9   :  { %4251 = vmatpush3.bf16.msra.mxu0 %v4857_v16 }
 0x6ea   :  { %4252 = vmatprep.subr.bf16.mxu0 %v4591_v0 }
 0x6ed   :  { %4254 = vmatpush3.bf16.msra.mxu0 %v4861_v19 }
 0x6ee   :  { %4279 = vmatprep.subr.bf16.mxu0 %v4591_v0 }
 0x763   :  { %v1481_v22 = vpop.f32.mrb[22].mxu0 }
 0x764   :  { %v3344_v25 = vpop.f32.mrb[23].mxu0 }
 0x783   :  { %v1624_v31 = vpop.f32.mrb[24].mxu0 }
 0x784   :  { %v1625_v37 = vadd.f32 %v1624_v31, %v1481_v22  ;;  %v3414_v62 = vpop.f32.mrb[25].mxu0  ;;  %v2170_v22 = vld [vmem:[#allocation16 + $0x58] sm:$0xff]  ;;  %v2171_v31 = vld [vmem:[#allocation16 + $0x60] sm:$0xff] }
 0x785   :  { %v4343_v25 = vpack.c.bf16 %v2170_v22, %v2169_v56 }
 0x786   :  { %v1628_v41 = vadd.f32 %v4961_v21, %v1625_v37  ;;  %v2172_v37 = vld [vmem:[#allocation16 + $0x68] sm:$0xff] }
 0x787   :  { %v4346_v62 = vpack.c.bf16 %v2172_v37, %v2171_v31 }
 0x788   :  { %4386 = vtanh.f32 %v1628_v41 }
 0x792   :  { %v4387_v58 = vpop.eup %4386 }
 0x793   :  { %3448 = vmatmul.mubr.f32.vlgmr.msra.gmra.mrb[18].mxu1 %v4387_v58 }
 0x794   :  { %4209 = vmatpush3.bf16.msra.mxu1 %v4867_v23  ;;  %3517 = vmatprep.mubr.msk.f32.mxu1 %vm4592_vm0, %v4593_v1 }
 0x795   :  { %4210 = vmatprep.subr.bf16.mxu1 %v4591_v0 }
 0x798   :  { %4212 = vmatpush3.bf16.msra.mxu1 %v4874_v27 }
 0x799   :  { %4213 = vmatprep.subr.bf16.mxu1 %v4591_v0 }
 0x79c   :  { %4215 = vmatpush3.bf16.msra.mxu1 %v4880_v30 }
 0x79d   :  { %4216 = vmatprep.subr.bf16.mxu1 %v4591_v0 }
 0x7a0   :  { %4218 = vmatpush3.bf16.msra.mxu1 %v4884_v34 }
 0x7a1   :  { %4219 = vmatprep.subr.bf16.mxu1 %v4591_v0 }
 0x7a3   :  { %v1768_v13 = vpop.f32.mrb[26].mxu0 }
 0x7a4   :  { %v1769_v16 = vadd.f32 %v1768_v13, %v4920_v9  ;;  %4221 = vmatpush3.bf16.msra.mxu1 %v4888_v38  ;;  %v3484_v19 = vpop.f32.mrb[27].mxu0 }
 0x7a5   :  { %4222 = vmatprep.subr.bf16.mxu1 %v4591_v0 }
 0x7a6   :  { %4388 = vtanh.f32 %v1769_v16 }
 0x7a8   :  { %4224 = vmatpush3.bf16.msra.mxu1 %v4893_v42 }
 0x7a9   :  { %4225 = vmatprep.subr.bf16.mxu1 %v4591_v0 }
 0x7ac   :  { %4227 = vmatpush3.bf16.msra.mxu1 %v4897_v47 }
 0x7ad   :  { %4228 = vmatprep.subr.bf16.mxu1 %v4591_v0 }
 0x7b0   :  { %v4389_v60 = vpop.eup %4388  ;;  %4230 = vmatpush3.bf16.msra.mxu1 %v4900_v50 }
 0x7b1   :  { %4255 = vmatprep.subr.bf16.mxu1 %v4591_v0 }
 0x7b3   :  { %3518 = vmatmul.mubr.f32.vlgmr.msra.gmra.mrb[20].mxu1 %v4389_v60 }
 0x7b4   :  { %4257 = vmatpush3.bf16.msra.mxu1 %v4802_v45  ;;  %3587 = vmatprep.mubr.msk.f32.mxu1 %vm4592_vm0, %v4593_v1 }
 0x7b5   :  { %4258 = vmatprep.subr.bf16.mxu1 %v4591_v0 }
 0x7b8   :  { %4260 = vmatpush3.bf16.msra.mxu1 %v4808_v49 }
 0x7b9   :  { %4261 = vmatprep.subr.bf16.mxu1 %v4591_v0 }
 0x7bc   :  { %4263 = vmatpush3.bf16.msra.mxu1 %v4812_v54 }
 0x7bd   :  { %4264 = vmatprep.subr.bf16.mxu1 %v4591_v0 }
 0x7c0   :  { %4266 = vmatpush3.bf16.msra.mxu1 %v4816_v59 }
 0x7c1   :  { %4267 = vmatprep.subr.bf16.mxu1 %v4591_v0 }
 0x7c4   :  { %4269 = vmatpush3.bf16.msra.mxu1 %v4820_v63 }
 0x7c5   :  { %4270 = vmatprep.subr.bf16.mxu1 %v4591_v0 }
 0x7c8   :  { %4272 = vmatpush3.bf16.msra.mxu1 %v4826_v4 }
 0x7c9   :  { %4273 = vmatprep.subr.bf16.mxu1 %v4591_v0 }
 0x7cc   :  { %4275 = vmatpush3.bf16.msra.mxu1 %v4830_v7 }
 0x7cd   :  { %4276 = vmatprep.subr.bf16.mxu1 %v4591_v0 }
 0x7d0   :  { %4278 = vmatpush3.bf16.msra.mxu1 %v4834_v10 }
 0x7d1   :  { %4303 = vmatprep.subr.bf16.mxu1 %v4591_v0 }
 0x7d3   :  { %3588 = vmatmul.mubr.f32.vlgmr.msra.gmra.mrb[22].mxu1 %v4389_v60 }
 0x7d4   :  { %3657 = vmatprep.mubr.msk.f32.mxu1 %vm4592_vm0, %v4593_v1 }
 0x866   :  { %v1696_v45 = vpop.f32.mrb[18].mxu1 }
 0x867   :  { %v3449_v49 = vpop.f32.mrb[19].mxu1 }
 0x868   :  { %v2173_v49 = vld [vmem:[#allocation16 + $0x70] sm:$0xff] }
 0x886   :  { %v1839_v54 = vpop.f32.mrb[20].mxu1 }
 0x887   :  { %v1840_v59 = vadd.f32 %v1839_v54, %v1696_v45  ;;  %v3519_v63 = vpop.f32.mrb[21].mxu1  ;;  %v2174_v54 = vld [vmem:[#allocation16 + $0x78] sm:$0xff] }
 0x888   :  { %v2273_v63 = vld [vmem:[%s5346_s8] ss:$0 sm:$0xff] }
 0x889   :  { %v1843_v4 = vadd.f32 %v4961_v21, %v1840_v59  ;;  %v4349_v59 = vpack.c.bf16 %v2174_v54, %v2173_v49 }
 0x88b   :  { %4390 = vtanh.f32 %v1843_v4 }
 0x895   :  { %v4391_v9 = vpop.eup %4390 }
 0x896   :  { %3553 = vmatmul.mubr.f32.vlgmr.msra.gmra.mrb[28].mxu0 %v4391_v9 }
 0x897   :  { %4281 = vmatpush3.bf16.msra.mxu0 %v4867_v23  ;;  %3622 = vmatprep.mubr.msk.f32.mxu0 %vm4592_vm0, %v4593_v1 }
 0x898   :  { %4282 = vmatprep.subr.bf16.mxu0 %v4591_v0 }
 0x89b   :  { %4284 = vmatpush3.bf16.msra.mxu0 %v4874_v27 }
 0x89c   :  { %4285 = vmatprep.subr.bf16.mxu0 %v4591_v0 }
 0x89f   :  { %4287 = vmatpush3.bf16.msra.mxu0 %v4880_v30  ;;  %v2065_v30 = vld [vmem:[#allocation14] sm:$0xff] }
 0x8a0   :  { %4288 = vmatprep.subr.bf16.mxu0 %v4591_v0 }
 0x8a3   :  { %4290 = vmatpush3.bf16.msra.mxu0 %v4884_v34  ;;  %v2066_v34 = vld [vmem:[#allocation14 + $0x8] sm:$0xff] }
 0x8a4   :  { %4291 = vmatprep.subr.bf16.mxu0 %v4591_v0 }
 0x8a6   :  { %v1983_v7 = vpop.f32.mrb[22].mxu1 }
 0x8a7   :  { %v1984_v10 = vadd.f32 %v1983_v7, %v4918_v6  ;;  %4293 = vmatpush3.bf16.msra.mxu0 %v4888_v38  ;;  %v3589_v23 = vpop.f32.mrb[23].mxu1  ;;  %v2067_v38 = vld [vmem:[#allocation14 + $0x10] sm:$0xff]  ;;  %v4304_v6 = vpack.c.bf16 %v2066_v34, %v2065_v30 }
 0x8a8   :  { %4294 = vmatprep.subr.bf16.mxu0 %v4591_v0 }
 0x8a9   :  { %4392 = vtanh.f32 %v1984_v10  ;;  %4305 = vmatpush3.bf16.msra.mxu1 %v4304_v6 }
 0x8aa   :  { %4306 = vmatprep.subr.bf16.mxu1 %v4591_v0 }
 0x8ab   :  { %4296 = vmatpush3.bf16.msra.mxu0 %v4893_v42  ;;  %v2068_v42 = vld [vmem:[#allocation14 + $0x18] sm:$0xff] }
 0x8ac   :  { %4297 = vmatprep.subr.bf16.mxu0 %v4591_v0  ;;  %v4307_v61 = vpack.c.bf16 %v2068_v42, %v2067_v38 }
 0x8ae   :  { %4308 = vmatpush3.bf16.msra.mxu1 %v4307_v61 }
 0x8af   :  { %4299 = vmatpush3.bf16.msra.mxu0 %v4897_v47  ;;  %v2069_v47 = vld [vmem:[#allocation14 + $0x20] sm:$0xff]  ;;  %4309 = vmatprep.subr.bf16.mxu1 %v4591_v0 }
 0x8b0   :  { %4300 = vmatprep.subr.bf16.mxu0 %v4591_v0  ;;  %v4310_v5 = vpack.c.bf16 %v2070_v2, %v2069_v47 }
 0x8b2   :  { %4311 = vmatpush3.bf16.msra.mxu1 %v4310_v5 }
 0x8b3   :  { %v4393_v27 = vpop.eup %4392  ;;  %4302 = vmatpush3.bf16.msra.mxu0 %v4900_v50  ;;  %v2071_v50 = vld [vmem:[#allocation14 + $0x30] sm:$0xff]  ;;  %4312 = vmatprep.subr.bf16.mxu1 %v4591_v0 }
 0x8b4   :  { %4327 = vmatprep.subr.bf16.mxu0 %v4591_v0  ;;  %v4313_v11 = vpack.c.bf16 %v2072_v8, %v2071_v50 }
 0x8b6   :  { %3623 = vmatmul.mubr.f32.vlgmr.msra.gmra.mrb[30].mxu0 %v4393_v27  ;;  %4314 = vmatpush3.bf16.msra.mxu1 %v4313_v11 }
 0x8b7   :  { %3692 = vmatprep.mubr.msk.f32.mxu0 %vm4592_vm0, %v4593_v1  ;;  %4315 = vmatprep.subr.bf16.mxu1 %v4591_v0  ;;  %v2073_v1 = vld [vmem:[#allocation14 + $0x40] sm:$0xff] }
 0x8b8   :  { %v4316_v14 = vpack.c.bf16 %v2074_v12, %v2073_v1  ;;  %4329 = vmatpush3.bf16.msra.mxu0 %v4328_v36 }
 0x8b9   :  { %4330 = vmatprep.subr.bf16.mxu0 %v4591_v0 }
 0x8ba   :  { %4317 = vmatpush3.bf16.msra.mxu1 %v4316_v14 }
 0x8bb   :  { %4318 = vmatprep.subr.bf16.mxu1 %v4591_v0 }
 0x8bc   :  { %4332 = vmatpush3.bf16.msra.mxu0 %v4331_v3 }
 0x8bd   :  { %4333 = vmatprep.subr.bf16.mxu0 %v4591_v0 }
 0x8be   :  { %4320 = vmatpush3.bf16.msra.mxu1 %v4319_v18 }
 0x8bf   :  { %4321 = vmatprep.subr.bf16.mxu1 %v4591_v0 }
 0x8c0   :  { %4335 = vmatpush3.bf16.msra.mxu0 %v4334_v44 }
 0x8c1   :  { %4336 = vmatprep.subr.bf16.mxu0 %v4591_v0 }
 0x8c2   :  { %4323 = vmatpush3.bf16.msra.mxu1 %v4322_v24 }
 0x8c3   :  { %4324 = vmatprep.subr.bf16.mxu1 %v4591_v0 }
 0x8c4   :  { %4338 = vmatpush3.bf16.msra.mxu0 %v4337_v51 }
 0x8c5   :  { %4339 = vmatprep.subr.bf16.mxu0 %v4591_v0 }
 0x8c6   :  { %4326 = vmatpush3.bf16.msra.mxu1 %v4325_v29 }
 0x8c8   :  { %4341 = vmatpush3.bf16.msra.mxu0 %v4340_v55 }
 0x8c9   :  { %4342 = vmatprep.subr.bf16.mxu0 %v4591_v0 }
 0x8cc   :  { %4344 = vmatpush3.bf16.msra.mxu0 %v4343_v25 }
 0x8cd   :  { %4345 = vmatprep.subr.bf16.mxu0 %v4591_v0 }
 0x8d0   :  { %4347 = vmatpush3.bf16.msra.mxu0 %v4346_v62 }
 0x8d1   :  { %4348 = vmatprep.subr.bf16.mxu0 %v4591_v0 }
 0x8d4   :  { %4350 = vmatpush3.bf16.msra.mxu0 %v4349_v59 }
 0x969   :  { %v1911_v41 = vpop.f32.mrb[28].mxu0 }
 0x96a   :  { %v3554_v58 = vpop.f32.mrb[29].mxu0 }
 0x989   :  { %v2054_v13 = vpop.f32.mrb[30].mxu0 }
 0x98a   :  { %v2055_v16 = vadd.f32 %v2054_v13, %v1911_v41  ;;  %v3624_v19 = vpop.f32.mrb[31].mxu0 }
 0x98c   :  { %v2058_v60 = vadd.f32 %v4961_v21, %v2055_v16  ;;  %v2274_v21 = vld [vmem:[%s5348_s10] ss:$0 sm:$0xff] }
 0x98e   :  { %4394 = vtanh.f32 %v2058_v60 }
 0x998   :  { %v4395_v45 = vpop.eup %4394 }
 0x999   :  { %3658 = vmatmul.mubr.f32.vlgmr.msra.gmra.mrb[24].mxu1 %v4395_v45 }
 0xa6c   :  { %v2154_v4 = vpop.f32.mrb[24].mxu1 }
 0xa6d   :  { %v2155_v0 = vadd.f32 %v2273_v63, %v2154_v4  ;;  %v3659_v9 = vpop.f32.mrb[25].mxu1 }
 0xa6f   :  { %v2158_v7 = vmax.f32 %v2155_v0, 0.0 }
 0xa71   :  { %3693 = vmatmul.mubr.f32.vlgmr.msra.gmra.mrb[32].mxu0 %v2158_v7 }
 0xb44   :  { %v2248_v10 = vpop.f32.mrb[32].mxu0 }
 0xb45   :  { %v2249_v23 = vadd.f32 %v2274_v21, %v2248_v10  ;;  %v3694_v27 = vpop.f32.mrb[33].mxu0 }
 0xb47   :  { %2252 = vst [vmem:[#allocation17] sm:$0xff] %v2249_v23 }
 0xb48   :  { %4561 = shalt.err (!%p4558_p4)
}
 0xb49   :  { %s4562_s25 = scalar_lea.hbm %s5349_s11, 128 }
 0xb4a   :  { %p4563_p5 = scmp.ne.s32.totalorder %s5349_s11, %s4562_s25  ;;  %p4566_p6 = scmp.lt.u32.totalorder %s4562_s25, %s5349_s11 }
 0xb4c   :  { %p4568_p7 = pnand %p4566_p6, %p4563_p5 }
 0xb4e   :  { %4571 = shalt.err (!%p4568_p7)
}
 0xb4f   :  { %2262 = dma.vmem_to_hbm [thread:$0]  %s2260_s26, 128, %s5349_s11, [#allocation7]  }
 0xb50   :  { %4580 = dma.done.wait [#allocation7], 128  }
 0xb51   :  { %4581 = vsyncadd [#allocation7], 4294967168 }
 0xb52   :  { %2266 = vsyncpa [#allocation6], 1 }
 0xb53   :  { %2267 = vsyncpa [#allocation9], 1 }
 0xb54   :  { %2268 = vsyncpa [#allocation12], 1 }
 0xb55   :  { %2269 = vsyncpa [#allocation15], 1 }
 0xb56   :  { %2270 = vsyncpa [#allocation7], 1 }

</bundles_post_ra>
